<compile_context>
chip_gen: v5e
topology: v5e:2x2
jax: 0.10.0
libtpu: 0.0.40
codegen_flags: <defaults>
</compile_context>

<pallas_src>
import jax
import jax.numpy as jnp
from jax.experimental import pallas as pl
from jax.experimental.pallas import tpu as pltpu


def _round_up(n, m):
    return (n + m - 1) // m * m


# ----------------------------------------------------------------------------
# Kernel
# ----------------------------------------------------------------------------
def _make_kernel(H, Hp, seq_len, has_xloc, mm_dtype):
    """Block layouts:
      x_ref / xl_ref : [R, 2H]     R = BB * seq_len flattened (batch, seq) rows
      cw_ref         : [4, Hp, 3*Hp]  stacked k=3 conv weights (pred1, pred2,
                                      upd1, upd2); tap k in lanes [k*Hp, k*Hp+H)
      cb_ref         : [4, 1, Hp]  matching biases (f32, zero-padded)
      m1_ref         : [2*Hp, Hp]  merge conv1; rows [0,H) = s-half weights,
                                      rows [Hp, Hp+H) = diff-half weights
      m2_ref         : [Hp, Hp]    merge conv2 weights
      mb_ref         : [2, 1, Hp]  merge biases (f32)
      out_ref        : [R, Hp]     lane-dense output (cols >= H are zero)
    """
    pad = Hp - H

    def kernel(*refs):
        if has_xloc:
            x_ref, xl_ref, cw_ref, cb_ref, m1_ref, m2_ref, mb_ref, out_ref = refs
        else:
            x_ref, cw_ref, cb_ref, m1_ref, m2_ref, mb_ref, out_ref = refs

        x = x_ref[...].astype(jnp.float32)                 # [R, 2H]
        R = x.shape[0]

        def split_pad(v):                                  # [R,2H] -> 2x [R,Hp]
            a, b = v[:, :H], v[:, H:]
            if pad:
                z = jnp.zeros((R, pad), jnp.float32)
                a = jnp.concatenate([a, z], axis=1)
                b = jnp.concatenate([b, z], axis=1)
            return a, b

        x_t, x_0 = split_pad(x)

        # Boundary masks at [R, 1], hoisted once and reused by all 4 convs.
        # pos == 0 / seq_len-1 are the zero-padded conv boundaries; blocks hold
        # whole batch elements, so these are also the batch boundaries and
        # rolled rows never leak across batch elements.
        pos = jax.lax.broadcasted_iota(jnp.int32, (R, 1), 0) % seq_len
        not_first = (pos != 0).astype(jnp.float32)
        not_last = (pos != seq_len - 1).astype(jnp.float32)

        def silu(v):
            return v * jax.nn.sigmoid(v)

        def conv3(v, i):
            # One wide MXU push [R, Hp] @ [Hp, 3*Hp]; the three tap slabs are
            # 128-lane aligned whole-vreg views. "prev"/"next" tap outputs are
            # shifted +/-1 row on the XLU and the wrapped boundary rows zeroed
            # (== the conv's zero padding).
            y = jnp.dot(v.astype(mm_dtype), cw_ref[i],
                        preferred_element_type=jnp.float32)        # [R, 3Hp]
            y_prev = not_first * pltpu.roll(y[:, :Hp], shift=1, axis=0)
            y_next = not_last * pltpu.roll(y[:, 2 * Hp:], shift=R - 1, axis=0)
            return y_prev + y[:, Hp:2 * Hp] + y_next + cb_ref[i]

        # predict_net
        pred = conv3(silu(conv3(x_t, 0)), 1)

        diff = x_0 - pred
        if has_xloc:
            xl_t, xl_0 = split_pad(xl_ref[...].astype(jnp.float32))
            diff = diff + (xl_t - xl_0)

        # update_net
        update = conv3(silu(conv3(diff, 2)), 3)
        s = x_t + update

        # merge_net (1x1 convs == matmuls). cat([s, diff]) is a lane-aligned
        # concat of two [R, Hp] slabs, so layer 1 is a single K=2*Hp dot.
        sd = jnp.concatenate([s, diff], axis=1)                    # [R, 2Hp]
        h = silu(jnp.dot(sd.astype(mm_dtype), m1_ref[...],
                         preferred_element_type=jnp.float32) + mb_ref[0])
        merged = jnp.dot(h.astype(mm_dtype), m2_ref[...],
                         preferred_element_type=jnp.float32) + mb_ref[1]

        out_ref[...] = merged.astype(out_ref.dtype)

    return kernel


# ----------------------------------------------------------------------------
# Capacity / grid planning
# ----------------------------------------------------------------------------
def _vmem_capacity_and_v7x():
    cap = 64 * 1024 * 1024            # conservative fallback = v7x per-core VMEM
    is_v7x = False
    try:
        info = pltpu.get_tpu_info()
        cap = int(getattr(info, "vmem_capacity_bytes", cap))
    except Exception:
        pass
    try:
        is_v7x = "v7" in jax.devices()[0].device_kind.lower()
    except Exception:
        pass
    return cap, is_v7x


def _plan_blocks(B, L, H, Hp, has_xloc, in_itemsize, out_itemsize, mm_itemsize):
    """Choose batch-rows per grid step and a vmem limit from actual sizes."""
    cap, is_v7x = _vmem_capacity_and_v7x()
    # Per-row VMEM: double-buffered x (+x_loc) and out blocks + live f32 temps.
    per_row = (2 * (2 * H) * in_itemsize * (2 if has_xloc else 1)
               + 2 * Hp * out_itemsize
               + 18 * Hp * 4)
    # Grid-invariant weights (still double-buffered; see TODO at top of file).
    weight_bytes = 2 * ((4 * Hp * 3 * Hp + 3 * Hp * Hp) * mm_itemsize
                        + 6 * Hp * 4)
    usable = int(0.6 * cap) - weight_bytes
    rows_target = max(usable // per_row, 0)

    valid = [bb for bb in range(1, B + 1)
             if B % bb == 0 and (bb == B or (bb * L) % 8 == 0)]
    fitting = [bb for bb in valid if bb * L <= rows_target]
    if not fitting:
        fitting = [min(valid)]        # TODO(synk): halo-tiled L path instead
    bb = max(fitting)                 # single-TC chips: one maximal block
    if is_v7x:
        # Megacore: prefer an even grid length >= 2 so neither core idles.
        even = [b for b in fitting if (B // b) >= 2 and (B // b) % 2 == 0]
        if even:
            bb = max(even)

    est = weight_bytes + (bb * L) * per_row
    vmem_limit = int(min(max(2 * est, 32 * 1024 * 1024), 0.8 * cap))
    return bb, vmem_limit


# ----------------------------------------------------------------------------
# Weight packing (done once in the wrapper)
# ----------------------------------------------------------------------------
def _pack_params(params, H, Hp, mm_dtype):
    def pack_conv3(w):                 # torch [H, H, 3] -> [Hp, 3*Hp]
        out = jnp.zeros((Hp, 3 * Hp), jnp.float32)
        for k in range(3):
            out = out.at[:H, k * Hp:k * Hp + H].set(w[:, :, k].T)
        return out

    def pad_bias(b):
        return jnp.zeros((Hp,), jnp.float32).at[:H].set(b)

    cw = jnp.stack([pack_conv3(params["pw1"]), pack_conv3(params["pw2"]),
                    pack_conv3(params["uw1"]), pack_conv3(params["uw2"])],
                   axis=0).astype(mm_dtype)                         # [4,Hp,3Hp]
    cb = jnp.stack([pad_bias(params["pb1"]), pad_bias(params["pb2"]),
                    pad_bias(params["ub1"]), pad_bias(params["ub2"])],
                   axis=0).reshape(4, 1, Hp)                        # f32

    m1 = jnp.zeros((2 * Hp, Hp), jnp.float32)
    m1 = m1.at[:H, :H].set(params["mw1"][:, :H].T)                  # s half
    m1 = m1.at[Hp:Hp + H, :H].set(params["mw1"][:, H:].T)           # diff half
    m2 = jnp.zeros((Hp, Hp), jnp.float32).at[:H, :H].set(params["mw2"].T)
    mb = jnp.stack([pad_bias(params["mb1"]), pad_bias(params["mb2"])],
                   axis=0).reshape(2, 1, Hp)                        # f32
    return cw, cb, m1.astype(mm_dtype), m2.astype(mm_dtype), mb


# ----------------------------------------------------------------------------
# Wrapper
# ----------------------------------------------------------------------------
def bidirectional_pooling(x, x_loc, params, *, mm_dtype=jnp.bfloat16,
                          block_batch=None):
    """x, x_loc: [B, L, D] with D = 2*hidden_dim. Returns [B, L, hidden_dim].

    mm_dtype: dtype of MXU operands (weights + activations at matmul sites).
    bf16 is MXU-native on v5e/v6e/v7x; accumulation and all elementwise / bias
    math remain f32. Pass bf16 x / x_loc to also halve the input/output HBM
    traffic (the op is HBM-bound for small-to-medium H).
    """
    B, L, D = x.shape
    H = D // 2
    assert D == 2 * H, "feature dim must be 2*hidden_dim"
    Hp = _round_up(H, 128)            # lane-aligned channel width inside kernel
    has_xloc = x_loc is not None

    in_b = jnp.dtype(x.dtype).itemsize
    mm_b = jnp.dtype(mm_dtype).itemsize
    bb_auto, vmem_limit = _plan_blocks(B, L, H, Hp, has_xloc, in_b, in_b, mm_b)
    BB = block_batch or bb_auto
    if B % BB != 0 or (BB != B and (BB * L) % 8 != 0):
        BB = B                        # full-array block always satisfies (8,128)
    R = BB * L                        # rows per grid step

    cw, cb, m1, m2, mb = _pack_params(params, H, Hp, mm_dtype)

    # Flatten (B, L) into rows; the channel split happens inside the kernel so
    # x / x_loc are read from HBM exactly once with no wrapper-side copies.
    x2 = x.reshape(B * L, D)
    inputs = [x2]
    data_spec = pl.BlockSpec((R, D), lambda i: (i, 0))
    in_specs = [data_spec]
    if has_xloc:
        inputs.append(x_loc.reshape(B * L, D))
        in_specs.append(data_spec)
    inputs += [cw, cb, m1, m2, mb]
    in_specs += [
        pl.BlockSpec((4, Hp, 3 * Hp), lambda i: (0, 0, 0)),
        pl.BlockSpec((4, 1, Hp), lambda i: (0, 0, 0)),
        pl.BlockSpec((2 * Hp, Hp), lambda i: (0, 0)),
        pl.BlockSpec((Hp, Hp), lambda i: (0, 0)),
        pl.BlockSpec((2, 1, Hp), lambda i: (0, 0, 0)),
    ]

    kernel = _make_kernel(H, Hp, L, has_xloc, mm_dtype)

    out = pl.pallas_call(
        kernel,
        out_shape=jax.ShapeDtypeStruct((B * L, Hp), x.dtype),
        grid=(B // BB,),
        in_specs=in_specs,
        out_specs=pl.BlockSpec((R, Hp), lambda i: (i, 0)),
        compiler_params=pltpu.CompilerParams(
            dimension_semantics=("parallel",),
            vmem_limit_bytes=vmem_limit,
        ),
    )(*inputs)

    if Hp != H:                       # drop the exact-zero lane padding
        out = out[:, :H]
    return out.reshape(B, L, H)


# ----------------------------------------------------------------------------
# Synthetic parameters (PyTorch layouts) + pure-JAX reference
# ----------------------------------------------------------------------------
def make_params(key, hidden_dim):
    """Synthetic parameters in PyTorch Conv1d layout: k=3 convs [O, C, 3];
    k=1 convs stored squeezed as [O, C]."""
    H = hidden_dim
    ks = jax.random.split(key, 12)
    sc = 0.1
    return {
        "pw1": jax.random.normal(ks[0], (H, H, 3), jnp.float32) * sc,
        "pb1": jax.random.normal(ks[1], (H,), jnp.float32) * sc,
        "pw2": jax.random.normal(ks[2], (H, H, 3), jnp.float32) * sc,
        "pb2": jax.random.normal(ks[3], (H,), jnp.float32) * sc,
        "uw1": jax.random.normal(ks[4], (H, H, 3), jnp.float32) * sc,
        "ub1": jax.random.normal(ks[5], (H,), jnp.float32) * sc,
        "uw2": jax.random.normal(ks[6], (H, H, 3), jnp.float32) * sc,
        "ub2": jax.random.normal(ks[7], (H,), jnp.float32) * sc,
        "mw1": jax.random.normal(ks[8], (H, 2 * H), jnp.float32) * sc,
        "mb1": jax.random.normal(ks[9], (H,), jnp.float32) * sc,
        "mw2": jax.random.normal(ks[10], (H, H), jnp.float32) * sc,
        "mb2": jax.random.normal(ks[11], (H,), jnp.float32) * sc,
    }


def _forward_ref(x, x_loc, p):
    """Pure-JAX reference matching the PyTorch forward."""
    H = x.shape[-1] // 2
    if x_loc is None:
        x_loc = jnp.zeros_like(x)
    x_t, x_0 = x[..., :H], x[..., H:]
    xl_t, xl_0 = x_loc[..., :H], x_loc[..., H:]

    def conv3(inp, w, b):  # inp [B,L,C], w torch [O,C,3]
        xp = jnp.pad(inp, ((0, 0), (1, 1), (0, 0)))
        return (jnp.einsum("blc,oc->blo", xp[:, :-2], w[:, :, 0])
                + jnp.einsum("blc,oc->blo", xp[:, 1:-1], w[:, :, 1])
                + jnp.einsum("blc,oc->blo", xp[:, 2:], w[:, :, 2]) + b)

    def silu(v):
        return v * jax.nn.sigmoid(v)

    pred = conv3(silu(conv3(x_t, p["pw1"], p["pb1"])), p["pw2"], p["pb2"])
    diff = x_0 - pred + (xl_t - xl_0)
    update = conv3(silu(conv3(diff, p["uw1"], p["ub1"])), p["uw2"], p["ub2"])
    s = x_t + update
    cat = jnp.concatenate([s, diff], axis=-1)
    h = silu(jnp.einsum("blc,oc->blo", cat, p["mw1"]) + p["mb1"])
    return jnp.einsum("blc,oc->blo", h, p["mw2"]) + p["mb2"]


# ----------------------------------------------------------------------------
# Test
# ----------------------------------------------------------------------------
if __name__ == "__main__":
    B, L, H = 4, 16, 32
    D = 2 * H  # input feature dim (split in half into x_t / x_0)

    key = jax.random.PRNGKey(0)
    kx, kloc, kp = jax.random.split(key, 3)
    x = jax.random.normal(kx, (B, L, D), jnp.float32)
    x_loc = jax.random.normal(kloc, (B, L, D), jnp.float32)
    params = make_params(kp, H)

    ref = _forward_ref(x, x_loc, params)

    # Exact path: f32 MXU operands, with and without x_loc.
    out = jax.block_until_ready(
        bidirectional_pooling(x, x_loc, params, mm_dtype=jnp.float32))
    assert out.shape == (B, L, H), out.shape
    assert jnp.allclose(out, ref, atol=1e-4, rtol=1e-4), \
        float(jnp.max(jnp.abs(out - ref)))

    out_nl = jax.block_until_ready(
        bidirectional_pooling(x, None, params, mm_dtype=jnp.float32))
    ref_nl = _forward_ref(x, None, params)
    assert jnp.allclose(out_nl, ref_nl, atol=1e-4, rtol=1e-4), \
        float(jnp.max(jnp.abs(out_nl - ref_nl)))

    # Multi-step grid path (block_batch=1 -> grid=(4,)), still exact.
    out_ms = jax.block_until_ready(
        bidirectional_pooling(x, x_loc, params, mm_dtype=jnp.float32,
                              block_batch=1))
    assert jnp.allclose(out_ms, ref, atol=1e-4, rtol=1e-4), \
        float(jnp.max(jnp.abs(out_ms - ref)))

    # Default fast path: bf16 MXU operands, f32 accumulation/elementwise.
    out_bf = jax.block_until_ready(bidirectional_pooling(x, x_loc, params))
    assert jnp.allclose(out_bf, ref, atol=1e-1, rtol=1e-1), \
        float(jnp.max(jnp.abs(out_bf - ref)))

    # bf16 I/O path (halves x / x_loc / out HBM traffic).
    out_b16 = jax.block_until_ready(
        bidirectional_pooling(x.astype(jnp.bfloat16),
                              x_loc.astype(jnp.bfloat16), params))
    assert out_b16.dtype == jnp.bfloat16
    assert float(jnp.max(jnp.abs(out_b16.astype(jnp.float32) - ref))) < 0.25

    print("KERNEL_OK")
</pallas_src>

<mosaic_0001>
module attributes {stable_mosaic.version = 11 : i64} {
  func.func @kernel(%arg0: i32, %arg1: memref<64x64xf32, #tpu.memory_space<vmem>>, %arg2: memref<64x64xf32, #tpu.memory_space<vmem>>, %arg3: memref<4x128x384xf32, #tpu.memory_space<vmem>>, %arg4: memref<4x1x128xf32, #tpu.memory_space<vmem>>, %arg5: memref<256x128xf32, #tpu.memory_space<vmem>>, %arg6: memref<128x128xf32, #tpu.memory_space<vmem>>, %arg7: memref<2x1x128xf32, #tpu.memory_space<vmem>>, %arg8: memref<64x128xf32, #tpu.memory_space<vmem>>) attributes {dimension_semantics = [#tpu.dimension_semantics<parallel>], iteration_bounds = array<i64: 1>, scalar_prefetch = 0 : i64, scratch_operands = 0 : i64, tpu.core_type = #tpu.core_type<tc>, window_params = [{transform_indices = @transform_0, window_bounds = array<i64: 64, 64>}, {transform_indices = @transform_1, window_bounds = array<i64: 64, 64>}, {pipeline_mode = #tpu.pipeline_mode<synchronous>, transform_indices = @transform_2, window_bounds = array<i64: 4, 128, 384>}, {pipeline_mode = #tpu.pipeline_mode<synchronous>, transform_indices = @transform_3, window_bounds = array<i64: 4, 1, 128>}, {pipeline_mode = #tpu.pipeline_mode<synchronous>, transform_indices = @transform_4, window_bounds = array<i64: 256, 128>}, {pipeline_mode = #tpu.pipeline_mode<synchronous>, transform_indices = @transform_5, window_bounds = array<i64: 128, 128>}, {pipeline_mode = #tpu.pipeline_mode<synchronous>, transform_indices = @transform_6, window_bounds = array<i64: 2, 1, 128>}, {transform_indices = @transform_7, window_bounds = array<i64: 64, 128>}]} {
    %c0 = arith.constant 0 : index
    %c0_0 = arith.constant 0 : index
    %0 = vector.load %arg1[%c0, %c0_0] : memref<64x64xf32, #tpu.memory_space<vmem>>, vector<64x64xf32>
    %1 = vector.extract_strided_slice %0 {offsets = [0, 0], sizes = [64, 32], strides = [1, 1]} : vector<64x64xf32> to vector<64x32xf32>
    %2 = vector.extract_strided_slice %0 {offsets = [0, 32], sizes = [64, 32], strides = [1, 1]} : vector<64x64xf32> to vector<64x32xf32>
    %cst = arith.constant 0.000000e+00 : f32
    %3 = vector.broadcast %cst : f32 to vector<64x96xf32>
    %4 = tpu.concatenate %1, %3 in 1 : vector<64x32xf32>, vector<64x96xf32> -> vector<64x128xf32>
    %5 = tpu.concatenate %2, %3 in 1 : vector<64x32xf32>, vector<64x96xf32> -> vector<64x128xf32>
    %6 = tpu.iota {dimensions = array<i32: 0>} : vector<64x1xi32>
    %c16_i32 = arith.constant 16 : i32
    %c0_i32 = arith.constant 0 : i32
    %7 = arith.cmpi eq, %c16_i32, %c0_i32 : i32
    %c1_i32 = arith.constant 1 : i32
    %8 = arith.select %7, %c1_i32, %c16_i32 : i32
    %9 = vector.broadcast %8 : i32 to vector<64x1xi32>
    %10 = arith.remsi %6, %9 : vector<64x1xi32>
    %c0_i32_1 = arith.constant 0 : i32
    %11 = vector.broadcast %c0_i32_1 : i32 to vector<64x1xi32>
    %12 = arith.cmpi ne, %10, %11 : vector<64x1xi32>
    %c0_i32_2 = arith.constant 0 : i32
    %13 = vector.broadcast %c0_i32_2 : i32 to vector<64x1xi32>
    %14 = arith.cmpi slt, %10, %13 : vector<64x1xi32>
    %c0_i32_3 = arith.constant 0 : i32
    %15 = arith.cmpi slt, %8, %c0_i32_3 : i32
    %16 = vector.broadcast %15 : i1 to vector<64x1xi1>
    %17 = vector.broadcast %16 : vector<64x1xi1> to vector<64x1xi1>
    %18 = arith.xori %14, %17 : vector<64x1xi1>
    %19 = arith.andi %18, %12 : vector<64x1xi1>
    %20 = vector.broadcast %8 : i32 to vector<64x1xi32>
    %21 = arith.addi %10, %20 : vector<64x1xi32>
    %22 = arith.select %19, %21, %10 : vector<64x1xi1>, vector<64x1xi32>
    %c0_i32_4 = arith.constant 0 : i32
    %23 = vector.broadcast %c0_i32_4 : i32 to vector<64x1xi32>
    %24 = arith.cmpi ne, %22, %23 : vector<64x1xi32>
    %25 = arith.extui %24 : vector<64x1xi1> to vector<64x1xi32>
    %26 = arith.sitofp %25 : vector<64x1xi32> to vector<64x1xf32>
    %c15_i32 = arith.constant 15 : i32
    %27 = vector.broadcast %c15_i32 : i32 to vector<64x1xi32>
    %28 = arith.cmpi ne, %22, %27 : vector<64x1xi32>
    %29 = arith.extui %28 : vector<64x1xi1> to vector<64x1xi32>
    %30 = arith.sitofp %29 : vector<64x1xi32> to vector<64x1xf32>
    %c0_5 = arith.constant 0 : index
    %c0_6 = arith.constant 0 : index
    %c0_7 = arith.constant 0 : index
    %31 = vector.load %arg3[%c0_5, %c0_6, %c0_7] : memref<4x128x384xf32, #tpu.memory_space<vmem>>, vector<1x128x384xf32>
    %32 = vector.shape_cast %31 : vector<1x128x384xf32> to vector<128x384xf32>
    %cst_8 = arith.constant dense<0.000000e+00> : vector<64x384xf32>
    %33 = tpu.matmul %4, %32, %cst_8 {dimension_numbers = #tpu.dot_dimension_numbers<[1], [0], [0], [1], [0, 0, 1, 1], [], []>} : vector<64x128xf32>, vector<128x384xf32>, vector<64x384xf32> -> vector<64x384xf32>
    %34 = vector.extract_strided_slice %33 {offsets = [0, 0], sizes = [64, 128], strides = [1, 1]} : vector<64x384xf32> to vector<64x128xf32>
    %c1_i32_9 = arith.constant 1 : i32
    %35 = tpu.dynamic_rotate %34 by %c1_i32_9 dim 0 : vector<64x128xf32>, i32 -> vector<64x128xf32>
    %36 = vector.broadcast %26 : vector<64x1xf32> to vector<64x128xf32>
    %37 = arith.mulf %36, %35 : vector<64x128xf32>
    %38 = vector.extract_strided_slice %33 {offsets = [0, 256], sizes = [64, 128], strides = [1, 1]} : vector<64x384xf32> to vector<64x128xf32>
    %c63_i32 = arith.constant 63 : i32
    %39 = tpu.dynamic_rotate %38 by %c63_i32 dim 0 : vector<64x128xf32>, i32 -> vector<64x128xf32>
    %40 = vector.broadcast %30 : vector<64x1xf32> to vector<64x128xf32>
    %41 = arith.mulf %40, %39 : vector<64x128xf32>
    %42 = vector.extract_strided_slice %33 {offsets = [0, 128], sizes = [64, 128], strides = [1, 1]} : vector<64x384xf32> to vector<64x128xf32>
    %43 = arith.addf %37, %42 : vector<64x128xf32>
    %44 = arith.addf %43, %41 : vector<64x128xf32>
    %c0_10 = arith.constant 0 : index
    %c0_11 = arith.constant 0 : index
    %c0_12 = arith.constant 0 : index
    %45 = vector.load %arg4[%c0_10, %c0_11, %c0_12] : memref<4x1x128xf32, #tpu.memory_space<vmem>>, vector<1x1x128xf32>
    %46 = vector.shape_cast %45 : vector<1x1x128xf32> to vector<1x128xf32>
    %47 = vector.broadcast %46 : vector<1x128xf32> to vector<64x128xf32>
    %48 = arith.addf %44, %47 : vector<64x128xf32>
    %49 = arith.negf %48 : vector<64x128xf32>
    %50 = math.exp %49 : vector<64x128xf32>
    %cst_13 = arith.constant 1.000000e+00 : f32
    %51 = vector.broadcast %cst_13 : f32 to vector<64x128xf32>
    %52 = arith.addf %51, %50 : vector<64x128xf32>
    %53 = arith.divf %51, %52 : vector<64x128xf32>
    %54 = arith.mulf %48, %53 : vector<64x128xf32>
    %c1 = arith.constant 1 : index
    %c0_14 = arith.constant 0 : index
    %c0_15 = arith.constant 0 : index
    %55 = vector.load %arg3[%c1, %c0_14, %c0_15] : memref<4x128x384xf32, #tpu.memory_space<vmem>>, vector<1x128x384xf32>
    %56 = vector.shape_cast %55 : vector<1x128x384xf32> to vector<128x384xf32>
    %cst_16 = arith.constant dense<0.000000e+00> : vector<64x384xf32>
    %57 = tpu.matmul %54, %56, %cst_16 {dimension_numbers = #tpu.dot_dimension_numbers<[1], [0], [0], [1], [0, 0, 1, 1], [], []>} : vector<64x128xf32>, vector<128x384xf32>, vector<64x384xf32> -> vector<64x384xf32>
    %58 = vector.extract_strided_slice %57 {offsets = [0, 0], sizes = [64, 128], strides = [1, 1]} : vector<64x384xf32> to vector<64x128xf32>
    %c1_i32_17 = arith.constant 1 : i32
    %59 = tpu.dynamic_rotate %58 by %c1_i32_17 dim 0 : vector<64x128xf32>, i32 -> vector<64x128xf32>
    %60 = vector.broadcast %26 : vector<64x1xf32> to vector<64x128xf32>
    %61 = arith.mulf %60, %59 : vector<64x128xf32>
    %62 = vector.extract_strided_slice %57 {offsets = [0, 256], sizes = [64, 128], strides = [1, 1]} : vector<64x384xf32> to vector<64x128xf32>
    %c63_i32_18 = arith.constant 63 : i32
    %63 = tpu.dynamic_rotate %62 by %c63_i32_18 dim 0 : vector<64x128xf32>, i32 -> vector<64x128xf32>
    %64 = vector.broadcast %30 : vector<64x1xf32> to vector<64x128xf32>
    %65 = arith.mulf %64, %63 : vector<64x128xf32>
    %66 = vector.extract_strided_slice %57 {offsets = [0, 128], sizes = [64, 128], strides = [1, 1]} : vector<64x384xf32> to vector<64x128xf32>
    %67 = arith.addf %61, %66 : vector<64x128xf32>
    %68 = arith.addf %67, %65 : vector<64x128xf32>
    %c1_19 = arith.constant 1 : index
    %c0_20 = arith.constant 0 : index
    %c0_21 = arith.constant 0 : index
    %69 = vector.load %arg4[%c1_19, %c0_20, %c0_21] : memref<4x1x128xf32, #tpu.memory_space<vmem>>, vector<1x1x128xf32>
    %70 = vector.shape_cast %69 : vector<1x1x128xf32> to vector<1x128xf32>
    %71 = vector.broadcast %70 : vector<1x128xf32> to vector<64x128xf32>
    %72 = arith.addf %68, %71 : vector<64x128xf32>
    %73 = arith.subf %5, %72 : vector<64x128xf32>
    %c0_22 = arith.constant 0 : index
    %c0_23 = arith.constant 0 : index
    %74 = vector.load %arg2[%c0_22, %c0_23] : memref<64x64xf32, #tpu.memory_space<vmem>>, vector<64x64xf32>
    %75 = vector.extract_strided_slice %74 {offsets = [0, 0], sizes = [64, 32], strides = [1, 1]} : vector<64x64xf32> to vector<64x32xf32>
    %76 = vector.extract_strided_slice %74 {offsets = [0, 32], sizes = [64, 32], strides = [1, 1]} : vector<64x64xf32> to vector<64x32xf32>
    %cst_24 = arith.constant 0.000000e+00 : f32
    %77 = vector.broadcast %cst_24 : f32 to vector<64x96xf32>
    %78 = tpu.concatenate %75, %77 in 1 : vector<64x32xf32>, vector<64x96xf32> -> vector<64x128xf32>
    %79 = tpu.concatenate %76, %77 in 1 : vector<64x32xf32>, vector<64x96xf32> -> vector<64x128xf32>
    %80 = arith.subf %78, %79 : vector<64x128xf32>
    %81 = arith.addf %73, %80 : vector<64x128xf32>
    %c2 = arith.constant 2 : index
    %c0_25 = arith.constant 0 : index
    %c0_26 = arith.constant 0 : index
    %82 = vector.load %arg3[%c2, %c0_25, %c0_26] : memref<4x128x384xf32, #tpu.memory_space<vmem>>, vector<1x128x384xf32>
    %83 = vector.shape_cast %82 : vector<1x128x384xf32> to vector<128x384xf32>
    %cst_27 = arith.constant dense<0.000000e+00> : vector<64x384xf32>
    %84 = tpu.matmul %81, %83, %cst_27 {dimension_numbers = #tpu.dot_dimension_numbers<[1], [0], [0], [1], [0, 0, 1, 1], [], []>} : vector<64x128xf32>, vector<128x384xf32>, vector<64x384xf32> -> vector<64x384xf32>
    %85 = vector.extract_strided_slice %84 {offsets = [0, 0], sizes = [64, 128], strides = [1, 1]} : vector<64x384xf32> to vector<64x128xf32>
    %c1_i32_28 = arith.constant 1 : i32
    %86 = tpu.dynamic_rotate %85 by %c1_i32_28 dim 0 : vector<64x128xf32>, i32 -> vector<64x128xf32>
    %87 = vector.broadcast %26 : vector<64x1xf32> to vector<64x128xf32>
    %88 = arith.mulf %87, %86 : vector<64x128xf32>
    %89 = vector.extract_strided_slice %84 {offsets = [0, 256], sizes = [64, 128], strides = [1, 1]} : vector<64x384xf32> to vector<64x128xf32>
    %c63_i32_29 = arith.constant 63 : i32
    %90 = tpu.dynamic_rotate %89 by %c63_i32_29 dim 0 : vector<64x128xf32>, i32 -> vector<64x128xf32>
    %91 = vector.broadcast %30 : vector<64x1xf32> to vector<64x128xf32>
    %92 = arith.mulf %91, %90 : vector<64x128xf32>
    %93 = vector.extract_strided_slice %84 {offsets = [0, 128], sizes = [64, 128], strides = [1, 1]} : vector<64x384xf32> to vector<64x128xf32>
    %94 = arith.addf %88, %93 : vector<64x128xf32>
    %95 = arith.addf %94, %92 : vector<64x128xf32>
    %c2_30 = arith.constant 2 : index
    %c0_31 = arith.constant 0 : index
    %c0_32 = arith.constant 0 : index
    %96 = vector.load %arg4[%c2_30, %c0_31, %c0_32] : memref<4x1x128xf32, #tpu.memory_space<vmem>>, vector<1x1x128xf32>
    %97 = vector.shape_cast %96 : vector<1x1x128xf32> to vector<1x128xf32>
    %98 = vector.broadcast %97 : vector<1x128xf32> to vector<64x128xf32>
    %99 = arith.addf %95, %98 : vector<64x128xf32>
    %100 = arith.negf %99 : vector<64x128xf32>
    %101 = math.exp %100 : vector<64x128xf32>
    %cst_33 = arith.constant 1.000000e+00 : f32
    %102 = vector.broadcast %cst_33 : f32 to vector<64x128xf32>
    %103 = arith.addf %102, %101 : vector<64x128xf32>
    %104 = arith.divf %102, %103 : vector<64x128xf32>
    %105 = arith.mulf %99, %104 : vector<64x128xf32>
    %c3 = arith.constant 3 : index
    %c0_34 = arith.constant 0 : index
    %c0_35 = arith.constant 0 : index
    %106 = vector.load %arg3[%c3, %c0_34, %c0_35] : memref<4x128x384xf32, #tpu.memory_space<vmem>>, vector<1x128x384xf32>
    %107 = vector.shape_cast %106 : vector<1x128x384xf32> to vector<128x384xf32>
    %cst_36 = arith.constant dense<0.000000e+00> : vector<64x384xf32>
    %108 = tpu.matmul %105, %107, %cst_36 {dimension_numbers = #tpu.dot_dimension_numbers<[1], [0], [0], [1], [0, 0, 1, 1], [], []>} : vector<64x128xf32>, vector<128x384xf32>, vector<64x384xf32> -> vector<64x384xf32>
    %109 = vector.extract_strided_slice %108 {offsets = [0, 0], sizes = [64, 128], strides = [1, 1]} : vector<64x384xf32> to vector<64x128xf32>
    %c1_i32_37 = arith.constant 1 : i32
    %110 = tpu.dynamic_rotate %109 by %c1_i32_37 dim 0 : vector<64x128xf32>, i32 -> vector<64x128xf32>
    %111 = vector.broadcast %26 : vector<64x1xf32> to vector<64x128xf32>
    %112 = arith.mulf %111, %110 : vector<64x128xf32>
    %113 = vector.extract_strided_slice %108 {offsets = [0, 256], sizes = [64, 128], strides = [1, 1]} : vector<64x384xf32> to vector<64x128xf32>
    %c63_i32_38 = arith.constant 63 : i32
    %114 = tpu.dynamic_rotate %113 by %c63_i32_38 dim 0 : vector<64x128xf32>, i32 -> vector<64x128xf32>
    %115 = vector.broadcast %30 : vector<64x1xf32> to vector<64x128xf32>
    %116 = arith.mulf %115, %114 : vector<64x128xf32>
    %117 = vector.extract_strided_slice %108 {offsets = [0, 128], sizes = [64, 128], strides = [1, 1]} : vector<64x384xf32> to vector<64x128xf32>
    %118 = arith.addf %112, %117 : vector<64x128xf32>
    %119 = arith.addf %118, %116 : vector<64x128xf32>
    %c3_39 = arith.constant 3 : index
    %c0_40 = arith.constant 0 : index
    %c0_41 = arith.constant 0 : index
    %120 = vector.load %arg4[%c3_39, %c0_40, %c0_41] : memref<4x1x128xf32, #tpu.memory_space<vmem>>, vector<1x1x128xf32>
    %121 = vector.shape_cast %120 : vector<1x1x128xf32> to vector<1x128xf32>
    %122 = vector.broadcast %121 : vector<1x128xf32> to vector<64x128xf32>
    %123 = arith.addf %119, %122 : vector<64x128xf32>
    %124 = arith.addf %4, %123 : vector<64x128xf32>
    %125 = tpu.concatenate %124, %81 in 1 : vector<64x128xf32>, vector<64x128xf32> -> vector<64x256xf32>
    %c0_42 = arith.constant 0 : index
    %c0_43 = arith.constant 0 : index
    %126 = vector.load %arg5[%c0_42, %c0_43] : memref<256x128xf32, #tpu.memory_space<vmem>>, vector<256x128xf32>
    %cst_44 = arith.constant dense<0.000000e+00> : vector<64x128xf32>
    %127 = tpu.matmul %125, %126, %cst_44 {dimension_numbers = #tpu.dot_dimension_numbers<[1], [0], [0], [1], [0, 0, 1, 1], [], []>} : vector<64x256xf32>, vector<256x128xf32>, vector<64x128xf32> -> vector<64x128xf32>
    %c0_45 = arith.constant 0 : index
    %c0_46 = arith.constant 0 : index
    %c0_47 = arith.constant 0 : index
    %128 = vector.load %arg7[%c0_45, %c0_46, %c0_47] : memref<2x1x128xf32, #tpu.memory_space<vmem>>, vector<1x1x128xf32>
    %129 = vector.shape_cast %128 : vector<1x1x128xf32> to vector<1x128xf32>
    %130 = vector.broadcast %129 : vector<1x128xf32> to vector<64x128xf32>
    %131 = arith.addf %127, %130 : vector<64x128xf32>
    %132 = arith.negf %131 : vector<64x128xf32>
    %133 = math.exp %132 : vector<64x128xf32>
    %cst_48 = arith.constant 1.000000e+00 : f32
    %134 = vector.broadcast %cst_48 : f32 to vector<64x128xf32>
    %135 = arith.addf %134, %133 : vector<64x128xf32>
    %136 = arith.divf %134, %135 : vector<64x128xf32>
    %137 = arith.mulf %131, %136 : vector<64x128xf32>
    %c0_49 = arith.constant 0 : index
    %c0_50 = arith.constant 0 : index
    %138 = vector.load %arg6[%c0_49, %c0_50] : memref<128x128xf32, #tpu.memory_space<vmem>>, vector<128x128xf32>
    %cst_51 = arith.constant dense<0.000000e+00> : vector<64x128xf32>
    %139 = tpu.matmul %137, %138, %cst_51 {dimension_numbers = #tpu.dot_dimension_numbers<[1], [0], [0], [1], [0, 0, 1, 1], [], []>} : vector<64x128xf32>, vector<128x128xf32>, vector<64x128xf32> -> vector<64x128xf32>
    %c1_52 = arith.constant 1 : index
    %c0_53 = arith.constant 0 : index
    %c0_54 = arith.constant 0 : index
    %140 = vector.load %arg7[%c1_52, %c0_53, %c0_54] : memref<2x1x128xf32, #tpu.memory_space<vmem>>, vector<1x1x128xf32>
    %141 = vector.shape_cast %140 : vector<1x1x128xf32> to vector<1x128xf32>
    %142 = vector.broadcast %141 : vector<1x128xf32> to vector<64x128xf32>
    %143 = arith.addf %139, %142 : vector<64x128xf32>
    %c0_55 = arith.constant 0 : index
    %c0_56 = arith.constant 0 : index
    %144 = vector.load %arg8[%c0_55, %c0_56] : memref<64x128xf32, #tpu.memory_space<vmem>>, vector<64x128xf32>
    tpu.vector_store %arg8[%c0_55, %c0_56], %143 {strides = array<i32>} : memref<64x128xf32, #tpu.memory_space<vmem>>, vector<64x128xf32>,
    return
  }
  func.func @transform_0(%arg0: i32) -> (i32, i32) {
    %c0_i32 = arith.constant 0 : i32
    %c0_i32_0 = arith.constant 0 : i32
    return %arg0, %c0_i32 : i32, i32
  }
  func.func @transform_1(%arg0: i32) -> (i32, i32) {
    %c0_i32 = arith.constant 0 : i32
    %c0_i32_0 = arith.constant 0 : i32
    return %arg0, %c0_i32 : i32, i32
  }
  func.func @transform_2(%arg0: i32) -> (i32, i32, i32) {
    %c0_i32 = arith.constant 0 : i32
    %c0_i32_0 = arith.constant 0 : i32
    %c0_i32_1 = arith.constant 0 : i32
    %c0_i32_2 = arith.constant 0 : i32
    return %c0_i32, %c0_i32_0, %c0_i32_1 : i32, i32, i32
  }
  func.func @transform_3(%arg0: i32) -> (i32, i32, i32) {
    %c0_i32 = arith.constant 0 : i32
    %c0_i32_0 = arith.constant 0 : i32
    %c0_i32_1 = arith.constant 0 : i32
    %c0_i32_2 = arith.constant 0 : i32
    return %c0_i32, %c0_i32_0, %c0_i32_1 : i32, i32, i32
  }
  func.func @transform_4(%arg0: i32) -> (i32, i32) {
    %c0_i32 = arith.constant 0 : i32
    %c0_i32_0 = arith.constant 0 : i32
    %c0_i32_1 = arith.constant 0 : i32
    return %c0_i32, %c0_i32_0 : i32, i32
  }
  func.func @transform_5(%arg0: i32) -> (i32, i32) {
    %c0_i32 = arith.constant 0 : i32
    %c0_i32_0 = arith.constant 0 : i32
    %c0_i32_1 = arith.constant 0 : i32
    return %c0_i32, %c0_i32_0 : i32, i32
  }
  func.func @transform_6(%arg0: i32) -> (i32, i32, i32) {
    %c0_i32 = arith.constant 0 : i32
    %c0_i32_0 = arith.constant 0 : i32
    %c0_i32_1 = arith.constant 0 : i32
    %c0_i32_2 = arith.constant 0 : i32
    return %c0_i32, %c0_i32_0, %c0_i32_1 : i32, i32, i32
  }
  func.func @transform_7(%arg0: i32) -> (i32, i32) {
    %c0_i32 = arith.constant 0 : i32
    %c0_i32_0 = arith.constant 0 : i32
    return %arg0, %c0_i32 : i32, i32
  }
}

</mosaic_0001>

<bundles_post_ra>
// kernel: tpu_custom_call.1
= control target key start
LH: loop header
LB: loop body
LE: loop exit
PB: predicated region body
PF: predicated region fallthrough
CT: control target
= control target key end

     0   :  { %12 = vsyncpa [#allocation3], 0  ;;  %s3691_s0 = inlined_call_operand.hbm [shape: f32[64,64], index: 0, kind: input, shape index: {}]   ;;  %s3692_s1 = inlined_call_operand.hbm [shape: f32[64,64], index: 1, kind: input, shape index: {}]   ;;  %s3693_s2 = inlined_call_operand.hbm [shape: f32[4,128,384], index: 2, kind: input, shape index: {}]   ;;  %s3694_s3 = inlined_call_operand.hbm [shape: f32[4,1,128], index: 3, kind: input, shape index: {}]   ;;  %s3695_s4 = inlined_call_operand.hbm [shape: f32[256,128], index: 4, kind: input, shape index: {}]   ;;  %s3696_s5 = inlined_call_operand.hbm [shape: f32[128,128], index: 5, kind: input, shape index: {}]   ;;  %s3697_s6 = inlined_call_operand.vmem [shape: f32[2,1,128], index: 6, kind: input, shape index: {}]   ;;  %s3698_s7 = inlined_call_operand.hbm [shape: f32[64,128], index: 7, kind: output, shape index: {}]  }
   0x1   :  { %13 = vsyncpa [#allocation6], 0 }
   0x2   :  { %14 = vsyncpa [#allocation9], 0 }
   0x3   :  { %15 = vsyncpa [#allocation12], 0 }
   0x4   :  { %16 = vsyncpa [#allocation4], 0  ;;  %s34_s26 = sshll.u32 %s3692_s1, 4  ;;  %s2513_s27 = smov [#allocation5]   ;;  %s35_s26 = int_to_ptr.hbm [resolvable:$true] %s34_s26 }
   0x5   :  { %s36_s28 = sshll.u32 %s2513_s27, 4  ;;  %s60_s8 = sshll.u32 %s3694_s3, 4  ;;  %s37_s28 = int_to_ptr.vmem [resolvable:$true] %s36_s28  ;;  %s61_s8 = int_to_ptr.hbm [resolvable:$true] %s60_s8 }
   0x6   :  { %s2514_s9 = smov 128   ;;  %s2515_s10 = smov 8  }
   0x7   :  { %42 = dma.hbm_to_vmem [thread:$0]  %s35_s26, 1024, %s37_s28, [#allocation6], %s2514_s9, %s2514_s9, %s2515_s10  }
   0x8   :  { %s2516_s11 = smov [#allocation8]   ;;  %s2517_s13 = smov 16  }
   0x9   :  { %s62_s12 = sshll.u32 %s2516_s11, 4  ;;  %s2518_s1 = smov 1   ;;  %s63_s12 = int_to_ptr.vmem [resolvable:$true] %s62_s12 }
   0xa   :  { %68 = dma.hbm_to_vmem [thread:$0]  %s61_s8, 64, %s63_s12, [#allocation9], %s2517_s13, %s2517_s13, %s2518_s1  }
   0xb   :  { %s21_s16 = sshll.u32 %s3691_s0, 4  ;;  %s2519_s17 = smov [#allocation2]   ;;  %s22_s16 = int_to_ptr.hbm [resolvable:$true] %s21_s16 }
   0xc   :  { %s23_s3 = sshll.u32 %s2519_s17, 4  ;;  %s47_s20 = sshll.u32 %s3693_s2, 4  ;;  %s24_s3 = int_to_ptr.vmem [resolvable:$true] %s23_s3  ;;  %s48_s20 = int_to_ptr.hbm [resolvable:$true] %s47_s20 }
   0xd   :  { %29 = dma.hbm_to_vmem [thread:$0]  %s22_s16, 1024, %s24_s3, [#allocation3], %s2514_s9, %s2514_s9, %s2515_s10  }
   0xe   :  { %s2520_s21 = smov [#allocation7]   ;;  %s2521_s23 = smov 384  }
   0xf   :  { %s49_s22 = sshll.u32 %s2520_s21, 4  ;;  %s2522_s24 = smov 24   ;;  %s50_s22 = int_to_ptr.vmem [resolvable:$true] %s49_s22 }
  0x10   :  { %55 = dma.hbm_to_vmem [thread:$0]  %s48_s20, 24576, %s50_s22, [#allocation6], %s2521_s23, %s2521_s23, %s2522_s24  }
  0x11   :  { %s73_s26 = sshll.u32 %s3695_s4, 4  ;;  %s2523_s27 = smov [#allocation10]   ;;  %s74_s26 = int_to_ptr.hbm [resolvable:$true] %s73_s26 }
  0x12   :  { %s75_s28 = sshll.u32 %s2523_s27, 4  ;;  %s86_s30 = sshll.u32 %s3696_s5, 4  ;;  %s76_s28 = int_to_ptr.vmem [resolvable:$true] %s75_s28  ;;  %s87_s30 = int_to_ptr.hbm [resolvable:$true] %s86_s30 }
  0x13   :  { %81 = dma.hbm_to_vmem [thread:$0]  %s74_s26, 4096, %s76_s28, [#allocation9], %s2514_s9, %s2514_s9, %s2515_s10  }
  0x14   :  { %s2524_s8 = smov [#allocation11]  }
  0x15   :  { %s88_s11 = sshll.u32 %s2524_s8, 4  ;;  %s89_s11 = int_to_ptr.vmem [resolvable:$true] %s88_s11 }
  0x16   :  { %94 = dma.hbm_to_vmem [thread:$0]  %s87_s30, 2048, %s89_s11, [#allocation12], %s2514_s9, %s2514_s9, %s2515_s10  }
  0x17   :  { %2503 = dma.done.wait [#allocation3], 1024  }
  0x18   :  { %2504 = vsyncadd [#allocation3], 4294966272 }
  0x19   :  { %2505 = dma.done.wait [#allocation6], 25600  }
  0x1a   :  { %2506 = vsyncadd [#allocation6], 4294941696 }
  0x1b   :  { %2507 = dma.done.wait [#allocation9], 4160  }
  0x1c   :  { %2508 = vsyncadd [#allocation9], 4294963136 }
  0x1d   :  { %2509 = dma.done.wait [#allocation12], 2048  }
  0x1e   :  { %2510 = vsyncadd [#allocation12], 4294965248  ;;  %v376_v0 = vld [vmem:[#allocation7 + $0x168] sm:$0xff]  ;;  %v377_v1 = vld [vmem:[#allocation7 + $0x170] sm:$0xff]  ;;  %vm129_vm0 = vcmask 261120   ;;  %s2525_s4 = smov 96   ;;  %v178_v59 = vlaneseq }
  0x1f   :  { %v378_v2 = vld [vmem:[#allocation7 + $0x178] sm:$0xff]  ;;  %379 = vmatpush.msra.mxu0 %v376_v0  ;;  %2162 = vmatpush.msra.mxu3 %v376_v0  ;;  %v373_v3 = vld [vmem:[#allocation7 + $0x150] sm:$0xff]  ;;  %v375_v5 = vld [vmem:[#allocation7 + $0x160] sm:$0xff]  ;;  %s2089_s17 = sshll.u32 %s3698_s7, 4  ;;  %s2090_s17 = int_to_ptr.hbm [resolvable:$true] %s2089_s17 }
  0x20   :  { %v374_v4 = vld [vmem:[#allocation7 + $0x158] sm:$0xff]  ;;  %420 = vmatpush.msra.mxu1 %v377_v1  ;;  %461 = vmatpush.msra.mxu2 %v378_v2  ;;  %v371_v7 = vld [vmem:[#allocation7 + $0x140] sm:$0xff]  ;;  %v372_v8 = vld [vmem:[#allocation7 + $0x148] sm:$0xff]  ;;  %v2662_v2 = vshrl.u32 %v178_v59, 7 }
  0x21   :  { %v370_v6 = vld [vmem:[#allocation7 + $0x138] sm:$0xff]  ;;  %380 = vmatpush.msra.mxu0 %v373_v3  ;;  %2163 = vmatpush.msra.mxu3 %v373_v3  ;;  %v367_v9 = vld [vmem:[#allocation7 + $0x120] sm:$0xff]  ;;  %v368_v10 = vld [vmem:[#allocation7 + $0x128] sm:$0xff] }
  0x22   :  { %421 = vmatpush.msra.mxu1 %v374_v4  ;;  %462 = vmatpush.msra.mxu2 %v375_v5  ;;  %v369_v11 = vld [vmem:[#allocation7 + $0x130] sm:$0xff]  ;;  %v364_v12 = vld [vmem:[#allocation7 + $0x108] sm:$0xff]  ;;  %v366_v14 = vld [vmem:[#allocation7 + $0x118] sm:$0xff]  ;;  %vm510_vm2 = vcmp.lt.s32.totalorder %v2662_v2, 1  ;;  %vm535_vm4 = vcmp.lt.s32.totalorder %v2662_v2, 7 }
  0x23   :  { %381 = vmatpush.msra.mxu0 %v370_v6  ;;  %2164 = vmatpush.msra.mxu3 %v370_v6  ;;  %v365_v13 = vld [vmem:[#allocation7 + $0x110] sm:$0xff]  ;;  %v362_v16 = vld [vmem:[#allocation7 + $0xf8] sm:$0xff]  ;;  %v363_v17 = vld [vmem:[#allocation7 + $0x100] sm:$0xff]  ;;  %v181_v6 = vadd.s32 16, %v2662_v2 }
  0x24   :  { %422 = vmatpush.msra.mxu1 %v371_v7  ;;  %463 = vmatpush.msra.mxu2 %v372_v8  ;;  %v361_v15 = vld [vmem:[#allocation7 + $0xf0] sm:$0xff]  ;;  %v358_v18 = vld [vmem:[#allocation7 + $0xd8] sm:$0xff]  ;;  %v359_v19 = vld [vmem:[#allocation7 + $0xe0] sm:$0xff] }
  0x25   :  { %382 = vmatpush.msra.mxu0 %v367_v9  ;;  %2165 = vmatpush.msra.mxu3 %v367_v9  ;;  %v360_v20 = vld [vmem:[#allocation7 + $0xe8] sm:$0xff]  ;;  %v355_v21 = vld [vmem:[#allocation7 + $0xc0] sm:$0xff]  ;;  %v357_v23 = vld [vmem:[#allocation7 + $0xd0] sm:$0xff] }
  0x26   :  { %423 = vmatpush.msra.mxu1 %v368_v10  ;;  %464 = vmatpush.msra.mxu2 %v369_v11  ;;  %v356_v22 = vld [vmem:[#allocation7 + $0xc8] sm:$0xff]  ;;  %v353_v25 = vld [vmem:[#allocation7 + $0xb0] sm:$0xff]  ;;  %v354_v26 = vld [vmem:[#allocation7 + $0xb8] sm:$0xff]  ;;  %v180_v10 = vadd.s32 8, %v2662_v2 }
  0x27   :  { %383 = vmatpush.msra.mxu0 %v364_v12  ;;  %2166 = vmatpush.msra.mxu3 %v364_v12  ;;  %v352_v24 = vld [vmem:[#allocation7 + $0xa8] sm:$0xff]  ;;  %v349_v27 = vld [vmem:[#allocation7 + $0x90] sm:$0xff]  ;;  %v350_v28 = vld [vmem:[#allocation7 + $0x98] sm:$0xff] }
  0x28   :  { %424 = vmatpush.msra.mxu1 %v365_v13  ;;  %465 = vmatpush.msra.mxu2 %v366_v14  ;;  %v351_v29 = vld [vmem:[#allocation7 + $0xa0] sm:$0xff]  ;;  %v346_v30 = vld [vmem:[#allocation7 + $0x78] sm:$0xff]  ;;  %v348_v32 = vld [vmem:[#allocation7 + $0x88] sm:$0xff] }
  0x29   :  { %384 = vmatpush.msra.mxu0 %v361_v15  ;;  %2167 = vmatpush.msra.mxu3 %v361_v15  ;;  %v347_v31 = vld [vmem:[#allocation7 + $0x80] sm:$0xff]  ;;  %v344_v34 = vld [vmem:[#allocation7 + $0x68] sm:$0xff]  ;;  %v345_v35 = vld [vmem:[#allocation7 + $0x70] sm:$0xff] }
  0x2a   :  { %425 = vmatpush.msra.mxu1 %v362_v16  ;;  %466 = vmatpush.msra.mxu2 %v363_v17  ;;  %v343_v33 = vld [vmem:[#allocation7 + $0x60] sm:$0xff]  ;;  %v340_v36 = vld [vmem:[#allocation7 + $0x48] sm:$0xff]  ;;  %v341_v37 = vld [vmem:[#allocation7 + $0x50] sm:$0xff]  ;;  %v205_v16 = vand.u32 15, %v181_v6 }
  0x2b   :  { %385 = vmatpush.msra.mxu0 %v358_v18  ;;  %2168 = vmatpush.msra.mxu3 %v358_v18  ;;  %v342_v38 = vld [vmem:[#allocation7 + $0x58] sm:$0xff]  ;;  %v337_v39 = vld [vmem:[#allocation7 + $0x30] sm:$0xff]  ;;  %v339_v41 = vld [vmem:[#allocation7 + $0x40] sm:$0xff]  ;;  %v198_v18 = vand.u32 15, %v180_v10 }
  0x2c   :  { %426 = vmatpush.msra.mxu1 %v359_v19  ;;  %467 = vmatpush.msra.mxu2 %v360_v20  ;;  %v338_v40 = vld [vmem:[#allocation7 + $0x38] sm:$0xff]  ;;  %v335_v43 = vld [vmem:[#allocation7 + $0x20] sm:$0xff]  ;;  %v336_v44 = vld [vmem:[#allocation7 + $0x28] sm:$0xff]  ;;  %vm2677_vm1 = vcmp.ne.s32.totalorder %v205_v16, 0 }
  0x2d   :  { %386 = vmatpush.msra.mxu0 %v355_v21  ;;  %2169 = vmatpush.msra.mxu3 %v355_v21  ;;  %v334_v42 = vld [vmem:[#allocation7 + $0x18] sm:$0xff]  ;;  %v331_v45 = vld [vmem:[#allocation7] sm:$0xff]  ;;  %v332_v46 = vld [vmem:[#allocation7 + $0x8] sm:$0xff]  ;;  %vm2682_vm3 = vcmp.ne.s32.totalorder %v198_v18, 15 }
  0x2e   :  { %427 = vmatpush.msra.mxu1 %v356_v22  ;;  %468 = vmatpush.msra.mxu2 %v357_v23  ;;  %v333_v47 = vld [vmem:[#allocation7 + $0x10] sm:$0xff]  ;;  %v121_v48 = vld [vmem:[#allocation2] sm:$0xff]  ;;  %v122_v50 = vld [vmem:[#allocation2 + $0x8] sm:$0xff] }
  0x2f   :  { %387 = vmatpush.msra.mxu0 %v352_v24  ;;  %2170 = vmatpush.msra.mxu3 %v352_v24  ;;  %v2598_v49 = vld [vmem:[#allocation2 + $0x20] sm:$0xff]  ;;  %v2605_v51 = vld [vmem:[#allocation2 + $0x28] sm:$0xff]  ;;  %v123_v52 = vld [vmem:[#allocation2 + $0x10] sm:$0xff] }
  0x30   :  { %428 = vmatpush.msra.mxu1 %v353_v25  ;;  %469 = vmatpush.msra.mxu2 %v354_v26  ;;  %v2612_v53 = vld [vmem:[#allocation2 + $0x30] sm:$0xff]  ;;  %v2619_v54 = vld [vmem:[#allocation2 + $0x18] sm:$0xff]  ;;  %v786_v63 = vld [vmem:[#allocation7 + $0x2e8] sm:$0xff] }
  0x31   :  { %388 = vmatpush.msra.mxu0 %v349_v27  ;;  %2171 = vmatpush.msra.mxu3 %v349_v27  ;;  %v2621_v55 = vld [vmem:[#allocation2 + $0x38] sm:$0xff]  ;;  %v787_v0 = vld [vmem:[#allocation7 + $0x2f0] sm:$0xff]  ;;  %v785_v5 = vld [vmem:[#allocation7 + $0x2e0] sm:$0xff] }
  0x32   :  { %429 = vmatpush.msra.mxu1 %v350_v28  ;;  %470 = vmatpush.msra.mxu2 %v351_v29  ;;  %v788_v1 = vld [vmem:[#allocation7 + $0x2f8] sm:$0xff]  ;;  %v783_v3 = vld [vmem:[#allocation7 + $0x2d0] sm:$0xff]  ;;  %v781_v8 = vld [vmem:[#allocation7 + $0x2c0] sm:$0xff] }
  0x33   :  { %389 = vmatpush.msra.mxu0 %v346_v30  ;;  %2172 = vmatpush.msra.mxu3 %v346_v30  ;;  %v784_v4 = vld [vmem:[#allocation7 + $0x2d8] sm:$0xff]  ;;  %v782_v9 = vld [vmem:[#allocation7 + $0x2c8] sm:$0xff]  ;;  %v777_v13 = vld [vmem:[#allocation7 + $0x2a0] sm:$0xff] }
  0x34   :  { %430 = vmatpush.msra.mxu1 %v347_v31  ;;  %471 = vmatpush.msra.mxu2 %v348_v32  ;;  %v780_v7 = vld [vmem:[#allocation7 + $0x2b8] sm:$0xff]  ;;  %v778_v14 = vld [vmem:[#allocation7 + $0x2a8] sm:$0xff]  ;;  %v779_v15 = vld [vmem:[#allocation7 + $0x2b0] sm:$0xff] }
  0x35   :  { %390 = vmatpush.msra.mxu0 %v343_v33  ;;  %2173 = vmatpush.msra.mxu3 %v343_v33  ;;  %v774_v19 = vld [vmem:[#allocation7 + $0x288] sm:$0xff]  ;;  %v775_v20 = vld [vmem:[#allocation7 + $0x290] sm:$0xff]  ;;  %v776_v21 = vld [vmem:[#allocation7 + $0x298] sm:$0xff] }
  0x36   :  { %431 = vmatpush.msra.mxu1 %v344_v34  ;;  %472 = vmatpush.msra.mxu2 %v345_v35  ;;  %v771_v25 = vld [vmem:[#allocation7 + $0x270] sm:$0xff]  ;;  %v772_v26 = vld [vmem:[#allocation7 + $0x278] sm:$0xff]  ;;  %v773_v27 = vld [vmem:[#allocation7 + $0x280] sm:$0xff] }
  0x37   :  { %391 = vmatpush.msra.mxu0 %v340_v36  ;;  %2174 = vmatpush.msra.mxu3 %v340_v36  ;;  %v768_v30 = vld [vmem:[#allocation7 + $0x258] sm:$0xff]  ;;  %v769_v31 = vld [vmem:[#allocation7 + $0x260] sm:$0xff]  ;;  %v770_v32 = vld [vmem:[#allocation7 + $0x268] sm:$0xff] }
  0x38   :  { %432 = vmatpush.msra.mxu1 %v341_v37  ;;  %473 = vmatpush.msra.mxu2 %v342_v38  ;;  %v2526_v37 = vmov 0.0   ;;  %v764_v59 = vld [vmem:[#allocation7 + $0x238] sm:$0xff]  ;;  %v753_v18 = vld [vmem:[#allocation7 + $0x1e0] sm:$0xff] }
  0x39   :  { %392 = vmatpush.msra.mxu0 %v337_v39  ;;  %2175 = vmatpush.msra.mxu3 %v337_v39  ;;  %v2697_v38 = vsel %vm2677_vm1, 1.0, %v2526_v37  ;;  %v756_v6 = vld [vmem:[#allocation7 + $0x1f8] sm:$0xff] }
  0x3a   :  { %433 = vmatpush.msra.mxu1 %v338_v40  ;;  %474 = vmatpush.msra.mxu2 %v339_v41  ;;  %v765_v40 = vld [vmem:[#allocation7 + $0x240] sm:$0xff]  ;;  %v766_v41 = vld [vmem:[#allocation7 + $0x248] sm:$0xff] }
  0x3b   :  { %393 = vmatpush.msra.mxu0 %v334_v42  ;;  %2176 = vmatpush.msra.mxu3 %v334_v42  ;;  %v767_v42 = vld [vmem:[#allocation7 + $0x250] sm:$0xff] }
  0x3c   :  { %434 = vmatpush.msra.mxu1 %v335_v43  ;;  %475 = vmatpush.msra.mxu2 %v336_v44  ;;  %v2708_v44 = vsel %vm2682_vm3, 1.0, %v2526_v37 }
  0x3d   :  { %394 = vmatpush.msra.mxu0 %v331_v45  ;;  %2177 = vmatpush.msra.mxu3 %v331_v45 }
  0x3e   :  { %435 = vmatpush.msra.mxu1 %v332_v46  ;;  %476 = vmatpush.msra.mxu2 %v333_v47  ;;  %v191_v46 = vand.u32 15, %v2662_v2 }
  0x3f   :  { %2113 = vmatmul.msk.f32.vlgmr.msra.gmra.mxu0 %vm129_vm0, %v121_v48  ;;  %2117 = vmatmul.msk.f32.vlgmr.msra.gmra.mxu3 %vm129_vm0, %v2598_v49 }
  0x40   :  { %2121 = vmatmul.msk.f32.vlgmr.msra.gmra.mxu1 %vm129_vm0, %v121_v48  ;;  %2129 = vmatmul.msk.f32.vlgmr.msra.gmra.mxu2 %vm129_vm0, %v121_v48  ;;  %vm283_vm5 = vcmp.ne.s32.totalorder %v191_v46, 0 }
  0x41   :  { %148 = vrot.lane.b32.xlu1 %v122_v50, %s2525_s4  ;;  %146 = vrot.lane.b32.xlu0 %v121_v48, %s2525_s4 }
  0x42   :  { %150 = vrot.lane.b32.xlu2 %v123_v52, %s2525_s4  ;;  %789 = vmatpush.msrb.mxu3 %v786_v63  ;;  %v2719_v63 = vld [vmem:[#allocation8] ss:$0 sm:$0xff] }
  0x43   :  { %830 = vmatpush.msrb.mxu0 %v787_v0  ;;  %871 = vmatpush.msrb.mxu1 %v788_v1 }
  0x44   :  { %790 = vmatpush.msrb.mxu3 %v783_v3  ;;  %v760_v3 = vld [vmem:[#allocation7 + $0x218] sm:$0xff] }
  0x45   :  { %831 = vmatpush.msrb.mxu0 %v784_v4  ;;  %872 = vmatpush.msrb.mxu1 %v785_v5  ;;  %v761_v4 = vld [vmem:[#allocation7 + $0x220] sm:$0xff]  ;;  %v182_v5 = vadd.s32 24, %v2662_v2 }
  0x46   :  { %791 = vmatpush.msrb.mxu3 %v780_v7  ;;  %v757_v7 = vld [vmem:[#allocation7 + $0x200] sm:$0xff] }
  0x47   :  { %2114 = vmatmul.msk.f32.gmra.mxu0 %vm129_vm0, %v122_v50  ;;  %2118 = vmatmul.msk.f32.gmra.mxu3 %vm129_vm0, %v2605_v51 }
  0x48   :  { %2122 = vmatmul.msk.f32.gmra.mxu1 %vm129_vm0, %v122_v50  ;;  %2130 = vmatmul.msk.f32.gmra.mxu2 %vm129_vm0, %v122_v50  ;;  %v762_v50 = vld [vmem:[#allocation7 + $0x228] sm:$0xff] }
  0x49   :  { %832 = vmatpush.msrb.mxu0 %v781_v8  ;;  %873 = vmatpush.msrb.mxu1 %v782_v9  ;;  %v758_v8 = vld [vmem:[#allocation7 + $0x208] sm:$0xff] }
  0x4a   :  { %792 = vmatpush.msrb.mxu3 %v777_v13 }
  0x4b   :  { %833 = vmatpush.msrb.mxu0 %v778_v14  ;;  %874 = vmatpush.msrb.mxu1 %v779_v15  ;;  %v2728_v14 = vsel %vm283_vm5, 1.0, %v2526_v37 }
  0x4c   :  { %793 = vmatpush.msrb.mxu3 %v774_v19  ;;  %v754_v19 = vld [vmem:[#allocation7 + $0x1e8] sm:$0xff] }
  0x4d   :  { %834 = vmatpush.msrb.mxu0 %v775_v20  ;;  %875 = vmatpush.msrb.mxu1 %v776_v21  ;;  %v755_v20 = vld [vmem:[#allocation7 + $0x1f0] sm:$0xff] }
  0x4e   :  { %794 = vmatpush.msrb.mxu3 %v771_v25  ;;  %v183_v25 = vadd.s32 32, %v2662_v2 }
  0x4f   :  { %2115 = vmatmul.msk.f32.gmra.mxu0 %vm129_vm0, %v123_v52  ;;  %2119 = vmatmul.msk.f32.gmra.mxu3 %vm129_vm0, %v2612_v53 }
  0x50   :  { %2123 = vmatmul.msk.f32.gmra.mxu1 %vm129_vm0, %v123_v52  ;;  %2131 = vmatmul.msk.f32.gmra.mxu2 %vm129_vm0, %v123_v52  ;;  %v763_v52 = vld [vmem:[#allocation7 + $0x230] sm:$0xff] }
  0x51   :  { %835 = vmatpush.msrb.mxu0 %v772_v26  ;;  %876 = vmatpush.msrb.mxu1 %v773_v27  ;;  %v212_v26 = vand.u32 15, %v182_v5 }
  0x52   :  { %795 = vmatpush.msrb.mxu3 %v768_v30  ;;  %v750_v30 = vld [vmem:[#allocation7 + $0x1c8] sm:$0xff] }
  0x53   :  { %836 = vmatpush.msrb.mxu0 %v769_v31  ;;  %877 = vmatpush.msrb.mxu1 %v770_v32  ;;  %v751_v31 = vld [vmem:[#allocation7 + $0x1d0] sm:$0xff]  ;;  %v752_v32 = vld [vmem:[#allocation7 + $0x1d8] sm:$0xff]  ;;  %vm310_vm6 = vcmp.ne.s32.totalorder %v212_v26, 15 }
  0x54   :  { %796 = vmatpush.msrb.mxu3 %v765_v40 }
  0x55   :  { %837 = vmatpush.msrb.mxu0 %v766_v41  ;;  %878 = vmatpush.msrb.mxu1 %v767_v42  ;;  %v747_v41 = vld [vmem:[#allocation7 + $0x1b0] sm:$0xff]  ;;  %v748_v42 = vld [vmem:[#allocation7 + $0x1b8] sm:$0xff] }
  0x56   :  { %797 = vmatpush.msrb.mxu3 %v762_v50  ;;  %v745_v50 = vld [vmem:[#allocation7 + $0x1a0] sm:$0xff] }
  0x57   :  { %2116 = vmatmul.msk.f32.gmra.mxu0 %vm129_vm0, %v2619_v54  ;;  %2120 = vmatmul.msk.f32.gmra.mxu3 %vm129_vm0, %v2621_v55 }
  0x58   :  { %2124 = vmatmul.msk.f32.gmra.mxu1 %vm129_vm0, %v2619_v54  ;;  %2132 = vmatmul.msk.f32.gmra.mxu2 %vm129_vm0, %v2619_v54 }
  0x59   :  { %838 = vmatpush.msrb.mxu0 %v763_v52  ;;  %879 = vmatpush.msrb.mxu1 %v764_v59  ;;  %v746_v52 = vld [vmem:[#allocation7 + $0x1a8] sm:$0xff]  ;;  %v219_v59 = vand.u32 15, %v183_v25 }
  0x5b   :  { %839 = vmatpush.msrb.mxu0 %v760_v3  ;;  %880 = vmatpush.msrb.mxu1 %v761_v4  ;;  %v2765_v4 = vsel %vm310_vm6, 1.0, %v2526_v37  ;;  %vm287_vm7 = vcmp.ne.s32.totalorder %v219_v59, 0 }
  0x5d   :  { %840 = vmatpush.msrb.mxu0 %v757_v7  ;;  %881 = vmatpush.msrb.mxu1 %v758_v8 }
  0x5f   :  { %841 = vmatpush.msrb.mxu0 %v754_v19  ;;  %882 = vmatpush.msrb.mxu1 %v755_v20  ;;  %v184_v19 = vadd.s32 40, %v2662_v2 }
  0x60   :  { %2125 = vmatmul.msk.f32.gmra.mxu1 %vm129_vm0, %v2598_v49  ;;  %2133 = vmatmul.msk.f32.gmra.mxu2 %vm129_vm0, %v2598_v49 }
  0x61   :  { %842 = vmatpush.msrb.mxu0 %v751_v31  ;;  %883 = vmatpush.msrb.mxu1 %v752_v32  ;;  %v226_v32 = vand.u32 15, %v184_v19 }
  0x63   :  { %843 = vmatpush.msrb.mxu0 %v748_v42  ;;  %vm312_vm8 = vcmp.ne.s32.totalorder %v226_v32, 15 }
  0x65   :  { %844 = vmatpush.msrb.mxu0 %v745_v50 }
  0x68   :  { %2126 = vmatmul.msk.f32.gmra.mxu1 %vm129_vm0, %v2605_v51  ;;  %2134 = vmatmul.msk.f32.gmra.mxu2 %vm129_vm0, %v2605_v51 }
  0x70   :  { %2127 = vmatmul.msk.f32.gmra.mxu1 %vm129_vm0, %v2612_v53  ;;  %2135 = vmatmul.msk.f32.gmra.mxu2 %vm129_vm0, %v2612_v53 }
  0x78   :  { %2128 = vmatmul.msk.f32.gmra.mxu1 %vm129_vm0, %v2621_v55  ;;  %2136 = vmatmul.msk.f32.gmra.mxu2 %vm129_vm0, %v2621_v55 }
  0xbc   :  { %v2650_v56 = vpop.f32.mrf.mxu0 }
  0xbd   :  { %v2652_v57 = vpop.f32.mrf.mxu1  ;;  %v502_v22 = vrot.slane %v2650_v56, 7 }
  0xc2   :  { %v2654_v58 = vpop.f32.mrf.mxu3 }
  0xc3   :  { %v2656_v60 = vpop.f32.mrf.mxu2 }
  0xc4   :  { %v2658_v61 = vpop.f32.mrf.mxu0 }
  0xc5   :  { %v2660_v62 = vpop.f32.mrf.mxu1  ;;  %v503_v23 = vrot.slane %v2658_v61, 7 }
  0xc7   :  { %v517_v34 = vsel %vm510_vm2, %v502_v22, %v503_v23 }
  0xc8   :  { %v553_v47 = vadd.f32 %v517_v34, %v2660_v62  ;;  %v759_v62 = vld [vmem:[#allocation7 + $0x210] sm:$0xff] }
  0xc9   :  { %798 = vmatpush.msrb.mxu3 %v759_v62 }
  0xca   :  { %v2666_v11 = vpop.f32.mrf.mxu3 }
  0xcb   :  { %v2668_v12 = vpop.f32.mrf.mxu2  ;;  %799 = vmatpush.msrb.mxu3 %v756_v6 }
  0xcc   :  { %v2674_v24 = vpop.f32.mrf.mxu0  ;;  %v528_v35 = vrot.slane %v2668_v12, 1  ;;  %v743_v12 = vld [vmem:[#allocation7 + $0x190] sm:$0xff] }
  0xcd   :  { %v2670_v17 = vpop.f32.mrf.mxu1  ;;  %v504_v28 = vrot.slane %v2674_v24, 7  ;;  %800 = vmatpush.msrb.mxu3 %v753_v18  ;;  %v2779_v18 = vsel %vm287_vm7, 1.0, %v2526_v37 }
  0xcf   :  { %v516_v43 = vsel %vm510_vm2, %v503_v23, %v504_v28  ;;  %801 = vmatpush.msrb.mxu3 %v750_v30 }
  0xd0   :  { %v521_v0 = vmul.f32 %v2697_v38, %v516_v43  ;;  %v749_v43 = vld [vmem:[#allocation7 + $0x1c0] sm:$0xff] }
  0xd1   :  { %802 = vmatpush.msrb.mxu3 %v747_v41  ;;  %884 = vmatpush.msrb.mxu1 %v749_v43  ;;  %v186_v41 = vadd.s32 56, %v2662_v2 }
  0xd2   :  { %v2691_v36 = vpop.f32.mrf.mxu3  ;;  %v554_v13 = vadd.f32 %v521_v0, %v2670_v17  ;;  %v527_v17 = vrot.slane %v2656_v60, 1  ;;  %v742_v0 = vld [vmem:[#allocation7 + $0x188] sm:$0xff] }
  0xd3   :  { %v2699_v39 = vpop.f32.mrf.mxu2  ;;  %885 = vmatpush.msrb.mxu1 %v746_v52  ;;  %845 = vmatpush.msrb.mxu0 %v742_v0  ;;  %v2807_v0 = vsel %vm312_vm8, 1.0, %v2526_v37 }
  0xd4   :  { %v529_v45 = vrot.slane %v2699_v39, 1  ;;  %v405_v27 = vpop.f32.mrf.mxu0 }
  0xd5   :  { %v2713_v48 = vpop.f32.mrf.mxu1  ;;  %886 = vmatpush.msrb.mxu1 %v743_v12 }
  0xd6   :  { %v541_v61 = vsel %vm535_vm4, %v528_v35, %v529_v45 }
  0xd7   :  { %v545_v1 = vmul.f32 %v2708_v44, %v541_v61  ;;  %v741_v61 = vld [vmem:[#allocation7 + $0x180] sm:$0xff] }
  0xd9   :  { %v561_v9 = vadd.f32 %v553_v47, %v545_v1  ;;  %v744_v47 = vld [vmem:[#allocation7 + $0x198] sm:$0xff] }
  0xda   :  { %v2724_v10 = vpop.f32.mrf.mxu3  ;;  %803 = vmatpush.msrb.mxu3 %v744_v47  ;;  %v240_v47 = vand.u32 15, %v186_v41 }
  0xdb   :  { %v509_v15 = vrot.slane %v2724_v10, 7  ;;  %v2731_v16 = vpop.f32.mrf.mxu2  ;;  %v2734_v21 = vadd.f32 %v2719_v63, %v561_v9 }
  0xdc   :  { %v530_v23 = vrot.slane %v2731_v16, 1  ;;  %804 = vmatpush.msrb.mxu3 %v741_v61  ;;  %v507_v61 = vrot.slane %v2666_v11, 7  ;;  %vm314_vm10 = vcmp.ne.s32.totalorder %v240_v47, 15 }
  0xdd   :  { %v518_v29 = vsel %vm510_vm2, %v509_v15, %v502_v22  ;;  %v2138_v33 = vmul.f32 -1.442695, %v2734_v21  ;;  %v449_v56 = vpop.f32.mrf.mxu1  ;;  %v505_v22 = vrot.slane %v405_v27, 7 }
  0xde   :  { %v519_v34 = vmul.f32 %v2728_v14, %v518_v29  ;;  %v540_v39 = vsel %vm535_vm4, %v529_v45, %v530_v23  ;;  %v542_v45 = vsel %vm535_vm4, %v527_v17, %v528_v35 }
  0xdf   :  { %v562_v40 = vadd.f32 %v554_v13, %v540_v39  ;;  %2231 = vpow2.f32 %v2138_v33 }
  0xe0   :  { %v552_v46 = vadd.f32 %v519_v34, %v2652_v57  ;;  %v515_v57 = vsel %vm510_vm2, %v504_v28, %v505_v22  ;;  %v506_v28 = vrot.slane %v2654_v58, 7 }
  0xe1   :  { %v2757_v1 = vadd.f32 %v2719_v63, %v562_v40  ;;  %v555_v7 = vadd.f32 %v515_v57, %v2713_v48 }
  0xe2   :  { %v560_v62 = vadd.f32 %v552_v46, %v542_v45  ;;  %v514_v58 = vsel %vm510_vm2, %v505_v22, %v506_v28 }
  0xe3   :  { %v490_v3 = vpop.f32.mrf.mxu2  ;;  %v2139_v35 = vmul.f32 -1.442695, %v2757_v1  ;;  %v523_v25 = vmul.f32 %v2779_v18, %v514_v58 }
  0xe4   :  { %v531_v5 = vrot.slane %v490_v3, 1  ;;  %v2768_v6 = vadd.f32 %v2719_v63, %v560_v62 }
  0xe5   :  { %v2232_v24 = vpop.eup %2231  ;;  %2233 = vpow2.f32 %v2139_v35  ;;  %v452_v48 = vpop.f32.mrf.mxu1  ;;  %v556_v31 = vadd.f32 %v523_v25, %v449_v56  ;;  %v508_v56 = vrot.slane %v2691_v36, 7 }
  0xe6   :  { %v539_v8 = vsel %vm535_vm4, %v530_v23, %v531_v5  ;;  %v2137_v9 = vmul.f32 -1.442695, %v2768_v6  ;;  %v2775_v13 = vadd.f32 1.0, %v2232_v24  ;;  %v185_v23 = vadd.s32 48, %v2662_v2 }
  0xe7   :  { %v547_v16 = vmul.f32 %v2765_v4, %v539_v8  ;;  %v512_v3 = vsel %vm510_vm2, %v507_v61, %v508_v56  ;;  %v513_v8 = vsel %vm510_vm2, %v506_v28, %v507_v61 }
  0xe8   :  { %2235 = vpow2.f32 %v2137_v9  ;;  %v233_v40 = vand.u32 15, %v185_v23  ;;  %v557_v58 = vadd.f32 %v513_v8, %v452_v48  ;;  %v511_v23 = vsel %vm510_vm2, %v508_v56, %v509_v15 }
  0xe9   :  { %v563_v20 = vadd.f32 %v555_v7, %v547_v16  ;;  %2237 = vrcp.f32 %v2775_v13  ;;  %vm632_vm11 = vweird.f32 %v2775_v13 }
  0xea   :  { %vm289_vm9 = vcmp.ne.s32.totalorder %v233_v40, 0 }
  0xeb   :  { %v493_v26 = vpop.f32.mrf.mxu2  ;;  %v2788_v27 = vadd.f32 %v2719_v63, %v563_v20  ;;  %v2234_v29 = vpop.eup %2233  ;;  %v2811_v12 = vsel %vm289_vm9, 1.0, %v2526_v37  ;;  %v2826_v20 = vsel %vm314_vm10, 1.0, %v2526_v37 }
  0xec   :  { %v532_v30 = vrot.slane %v493_v26, 1  ;;  %v2794_v22 = vadd.f32 1.0, %v2234_v29  ;;  %v525_v19 = vmul.f32 %v2811_v12, %v512_v3 }
  0xed   :  { %v2140_v33 = vmul.f32 -1.442695, %v2788_v27  ;;  %v455_v52 = vpop.f32.mrf.mxu1 }
  0xee   :  { %v2236_v34 = vpop.eup %2235  ;;  %v538_v39 = vsel %vm535_vm4, %v531_v5, %v532_v30  ;;  %vm647_vm6 = vweird.f32 %v2794_v22 }
  0xef   :  { %v564_v42 = vadd.f32 %v556_v31, %v538_v39  ;;  %v604_v43 = vadd.f32 1.0, %v2236_v34  ;;  %v2796_v46 = vpop.eup %2237  ;;  %2239 = vpow2.f32 %v2140_v33  ;;  %v558_v33 = vadd.f32 %v525_v19, %v455_v52 }
  0xf0   :  { %v628_v59 = vmul.f32 %v2796_v46, %v2775_v13  ;;  %vm633_vm14 = vweird.f32 %v2796_v46 }
  0xf1   :  { %2241 = vrcp.f32 %v604_v43  ;;  %v2800_v50 = vadd.f32 %v2719_v63, %v564_v42  ;;  %v621_v26 = vand.u32 2147483647, %v604_v43  ;;  %v623_v28 = vand.u32 2147483648, %v604_v43  ;;  %vm2865_vm3 = vmor %vm632_vm11, %vm633_vm14 }
  0xf2   :  { %2243 = vrcp.f32 %v2794_v22  ;;  %v629_v24 = vsub.f32 1.0, %v628_v59  ;;  %vm617_vm13 = vweird.f32 %v604_v43 }
  0xf3   :  { %v496_v45 = vpop.f32.mrf.mxu2  ;;  %v2141_v36 = vmul.f32 -1.442695, %v2800_v50  ;;  %vm622_vm1 = vcmp.eq.f32.partialorder %v621_v26, 8.507059e+37 }
  0xf4   :  { %v533_v57 = vrot.slane %v496_v45, 1 }
  0xf5   :  { %v2240_v62 = vpop.eup %2239  ;;  %2245 = vpow2.f32 %v2141_v36  ;;  %v458_v15 = vpop.f32.mrf.mxu1  ;;  %v636_v36 = vand.u32 2147483647, %v2775_v13 }
  0xf6   :  { %v537_v35 = vsel %vm535_vm4, %v532_v30, %v533_v57  ;;  %v2818_v7 = vadd.f32 1.0, %v2240_v62  ;;  %v630_v30 = vmul.f32 %v2796_v46, %v629_v24  ;;  %v559_v52 = vadd.f32 %v511_v23, %v458_v15 }
  0xf7   :  { %v2242_v5 = vpop.eup %2241  ;;  %v549_v11 = vmul.f32 %v2807_v0, %v537_v35  ;;  %vm637_vm5 = vcmp.eq.f32.partialorder %v636_v36, 8.507059e+37  ;;  %v2918_v36 = vld [vmem:[#allocation5 + $0x18] sm:$0xff] }
  0xf8   :  { %v613_v9 = vmul.f32 %v2242_v5, %v604_v43  ;;  %v2822_v16 = vpop.eup %2243  ;;  %2247 = vrcp.f32 %v2818_v7  ;;  %vm618_vm12 = vweird.f32 %v2242_v5  ;;  %v624_v43 = vor.u32 1.1754944e-38, %v623_v28 }
  0xf9   :  { %v565_v48 = vadd.f32 %v557_v58, %v549_v11  ;;  %v643_v10 = vmul.f32 %v2822_v16, %v2794_v22  ;;  %vm619_vm15 = vmor %vm617_vm13, %vm618_vm12  ;;  %v631_v59 = vadd.f32 %v2796_v46, %v630_v30  ;;  %v2876_v58 = vld [vmem:[#allocation5 + $0x8] sm:$0xff]  ;;  %vm648_vm7 = vweird.f32 %v2822_v16 }
  0xfa   :  { %v614_v25 = vsub.f32 1.0, %v613_v9  ;;  %1023 = vrot.lane.b32.xlu1 %v2876_v58, %s2525_s4  ;;  %v653_v28 = vand.u32 2147483648, %v2794_v22  ;;  %vm649_vm8 = vmor %vm647_vm6, %vm648_vm7  ;;  %vm662_vm10 = vweird.f32 %v2818_v7 }
  0xfb   :  { %v499_v29 = vpop.f32.mrf.mxu2  ;;  %v2246_v31 = vpop.eup %2245  ;;  %v2839_v34 = vadd.f32 %v2719_v63, %v565_v48  ;;  %v644_v61 = vsub.f32 1.0, %v643_v10  ;;  %v651_v48 = vand.u32 2147483647, %v2794_v22  ;;  %v2899_v22 = vld [vmem:[#allocation5] sm:$0xff] }
  0xfc   :  { %v534_v32 = vrot.slane %v499_v29, 1  ;;  %v615_v37 = vmul.f32 %v2242_v5, %v614_v25  ;;  %v2847_v42 = vadd.f32 1.0, %v2246_v31  ;;  %1021 = vrot.lane.b32.xlu0 %v2899_v22, %s2525_s4 }
  0xfd   :  { %v2142_v62 = vmul.f32 -1.442695, %v2839_v34  ;;  %v645_v24 = vmul.f32 %v2822_v16, %v644_v61  ;;  %vm652_vm9 = vcmp.eq.f32.partialorder %v651_v48, 8.507059e+37  ;;  %v2958_v48 = vld [vmem:[#allocation5 + $0x30] sm:$0xff] }
  0xfe   :  { %v536_v39 = vsel %vm535_vm4, %v533_v57, %v534_v32  ;;  %v543_v40 = vsel %vm535_vm4, %v534_v32, %v527_v17  ;;  %v616_v41 = vadd.f32 %v2242_v5, %v615_v37  ;;  %v2851_v57 = vpop.eup %2247  ;;  %v638_v17 = vand.u32 2147483648, %v2775_v13 }
  0xff   :  { %v551_v56 = vmul.f32 %v2826_v20, %v543_v40  ;;  %v566_v47 = vadd.f32 %v558_v33, %v536_v39  ;;  %2249 = vrcp.f32 %v2847_v42  ;;  %v658_v8 = vmul.f32 %v2851_v57, %v2818_v7 }
 0x100   :  { %v620_v45 = vsel %vm619_vm15, %v2242_v5, %v616_v41  ;;  %2251 = vpow2.f32 %v2142_v62  ;;  %v639_v13 = vor.u32 1.1754944e-38, %v638_v17  ;;  %v646_v25 = vadd.f32 %v2822_v16, %v645_v24 }
 0x101   :  { %v625_v60 = vsel %vm622_vm1, %v624_v43, %v620_v45  ;;  %v2859_v35 = vadd.f32 %v2719_v63, %v566_v47  ;;  %v567_v5 = vadd.f32 %v559_v52, %v551_v56  ;;  %v659_v26 = vsub.f32 1.0, %v658_v8 }
 0x102   :  { %v732_v3 = vmul.f32 %v625_v60, %v2768_v6  ;;  %v635_v6 = vsel %vm2865_vm3, %v2796_v46, %v631_v59  ;;  %v650_v37 = vsel %vm649_vm8, %v2822_v16, %v646_v25  ;;  %vm663_vm11 = vweird.f32 %v2851_v57  ;;  %1027 = vrot.lane.b32.xlu1 %v2918_v36, %s2525_s4 }
 0x103   :  { %v2143_v9 = vmul.f32 -1.442695, %v2859_v35  ;;  %v2881_v19 = vadd.f32 %v2719_v63, %v567_v5  ;;  %v640_v46 = vsel %vm637_vm5, %v639_v13, %v635_v6  ;;  %v660_v10 = vmul.f32 %v2851_v57, %v659_v26  ;;  %vm664_vm12 = vmor %vm662_vm10, %vm663_vm11 }
 0x104   :  { %805 = vmatmul.f32.vlgmr.msrb.gmra.mxu3 %v732_v3  ;;  %846 = vmatmul.f32.vlgmr.msrb.gmra.mxu0 %v732_v3  ;;  %v733_v30 = vmul.f32 %v640_v46, %v2734_v21  ;;  %v654_v21 = vor.u32 1.1754944e-38, %v653_v28  ;;  %v668_v41 = vand.u32 2147483648, %v2818_v7  ;;  %v666_v43 = vand.u32 2147483647, %v2818_v7 }
 0x105   :  { %887 = vmatmul.f32.vlgmr.msrb.gmra.mxu1 %v732_v3  ;;  %2253 = vpow2.f32 %v2143_v9  ;;  %v2883_v23 = vpop.eup %2249  ;;  %v2144_v63 = vmul.f32 -1.442695, %v2881_v19  ;;  %v661_v16 = vadd.f32 %v2851_v57, %v660_v10  ;;  %152 = vrot.lane.b32.xlu0 %v2619_v54, %s2525_s4  ;;  %v683_v3 = vand.u32 2147483648, %v2847_v42  ;;  %v2939_v9 = vld [vmem:[#allocation5 + $0x20] sm:$0xff] }
 0x106   :  { %v2252_v29 = vpop.eup %2251  ;;  %v673_v33 = vmul.f32 %v2883_v23, %v2847_v42  ;;  %v655_v15 = vsel %vm652_vm9, %v654_v21, %v650_v37  ;;  %v669_v60 = vor.u32 1.1754944e-38, %v668_v41  ;;  %vm667_vm13 = vcmp.eq.f32.partialorder %v666_v43, 8.507059e+37 }
 0x107   :  { %v2891_v31 = vadd.f32 1.0, %v2252_v29  ;;  %v734_v47 = vmul.f32 %v655_v15, %v2757_v1  ;;  %v665_v45 = vsel %vm664_vm12, %v2851_v57, %v661_v16  ;;  %vm678_vm14 = vweird.f32 %v2883_v23 }
 0x108   :  { %v674_v40 = vsub.f32 1.0, %v673_v33  ;;  %v670_v1 = vsel %vm667_vm13, %v669_v60, %v665_v45  ;;  %vm677_vm15 = vweird.f32 %v2847_v42  ;;  %v681_v11 = vand.u32 2147483647, %v2847_v42  ;;  %v2972_v33 = vld [vmem:[#allocation5 + $0x38] sm:$0xff]  ;;  %v1106_v60 = vld [vmem:[#allocation7 + $0x420] sm:$0xff] }
 0x109   :  { %2255 = vrcp.f32 %v2891_v31  ;;  %v735_v5 = vmul.f32 %v670_v1, %v2788_v27  ;;  %vm679_vm1 = vmor %vm677_vm15, %vm678_vm14  ;;  %v684_v8 = vor.u32 1.1754944e-38, %v683_v3  ;;  %v2941_v27 = vld [vmem:[#allocation5 + $0x10] sm:$0xff]  ;;  %v698_v25 = vand.u32 2147483648, %v2891_v31  ;;  %v1103_v1 = vld [vmem:[#allocation7 + $0x408] sm:$0xff] }
 0x10a   :  { %2257 = vpow2.f32 %v2144_v63  ;;  %v675_v59 = vmul.f32 %v2883_v23, %v674_v40  ;;  %vm682_vm3 = vcmp.eq.f32.partialorder %v681_v11, 8.507059e+37  ;;  %1025 = vrot.lane.b32.xlu2 %v2941_v27, %s2525_s4  ;;  %156 = vrot.lane.b32.xlu1 %v2605_v51, %s2525_s4  ;;  %vm692_vm6 = vweird.f32 %v2891_v31  ;;  %v1116_v3 = vld [vmem:[#allocation7 + $0x470] sm:$0xff]  ;;  %v1113_v11 = vld [vmem:[#allocation7 + $0x458] sm:$0xff] }
 0x10b   :  { %v2254_v32 = vpop.eup %2253  ;;  %v696_v29 = vand.u32 2147483647, %v2891_v31  ;;  %v699_v63 = vor.u32 1.1754944e-38, %v698_v25  ;;  %1159 = vmatpush.msra.mxu3 %v1116_v3  ;;  %v1104_v25 = vld [vmem:[#allocation7 + $0x410] sm:$0xff] }
 0x10c   :  { %808 = vmatmul.f32.gmra.mxu3 %v733_v30  ;;  %849 = vmatmul.f32.gmra.mxu0 %v733_v30  ;;  %v2903_v39 = vadd.f32 1.0, %v2254_v32  ;;  %v676_v57 = vadd.f32 %v2883_v23, %v675_v59  ;;  %v1112_v59 = vld [vmem:[#allocation7 + $0x450] sm:$0xff] }
 0x10d   :  { %890 = vmatmul.f32.gmra.mxu1 %v733_v30  ;;  %1029 = vrot.lane.b32.xlu0 %v2939_v9, %s2525_s4  ;;  %vm697_vm8 = vcmp.eq.f32.partialorder %v696_v29, 8.507059e+37  ;;  %v1101_v29 = vld [vmem:[#allocation7 + $0x3f8] sm:$0xff]  ;;  %v1072_v3 = vld [vmem:[#allocation7 + $0x310] sm:$0xff] }
 0x10e   :  { %2259 = vrcp.f32 %v2903_v39  ;;  %v680_v54 = vsel %vm679_vm1, %v2883_v23, %v676_v57  ;;  %v713_v37 = vand.u32 2147483648, %v2903_v39  ;;  %vm707_vm10 = vweird.f32 %v2903_v39  ;;  %1160 = vmatpush.msra.mxu3 %v1113_v11 }
 0x10f   :  { %v2909_v56 = vpop.eup %2255  ;;  %v685_v42 = vsel %vm682_vm3, %v684_v8, %v680_v54  ;;  %v1114_v54 = vld [vmem:[#allocation7 + $0x460] sm:$0xff] }
 0x110   :  { %v2258_v52 = vpop.eup %2257  ;;  %v688_v61 = vmul.f32 %v2909_v56, %v2891_v31  ;;  %vm693_vm5 = vweird.f32 %v2909_v56  ;;  %v736_v26 = vmul.f32 %v685_v42, %v2800_v50  ;;  %v714_v16 = vor.u32 1.1754944e-38, %v713_v37  ;;  %v1110_v8 = vld [vmem:[#allocation7 + $0x440] sm:$0xff]  ;;  %v1111_v42 = vld [vmem:[#allocation7 + $0x448] sm:$0xff]  ;;  %v1096_v37 = vld [vmem:[#allocation7 + $0x3d0] sm:$0xff] }
 0x111   :  { %v2924_v7 = vadd.f32 1.0, %v2258_v52  ;;  %vm694_vm7 = vmor %vm692_vm6, %vm693_vm5  ;;  %1161 = vmatpush.msra.mxu3 %v1110_v8 }
 0x112   :  { %v689_v17 = vsub.f32 1.0, %v688_v61  ;;  %154 = vrot.lane.b32.xlu2 %v2598_v49, %s2525_s4  ;;  %1033 = vrot.lane.b32.xlu1 %v2958_v48, %s2525_s4  ;;  %v2974_v49 = vld [vmem:[#allocation5 + $0x28] sm:$0xff]  ;;  %v1109_v61 = vld [vmem:[#allocation7 + $0x438] sm:$0xff] }
 0x113   :  { %2261 = vrcp.f32 %v2924_v7  ;;  %v728_v40 = vand.u32 2147483648, %v2924_v7  ;;  %vm722_vm14 = vweird.f32 %v2924_v7 }
 0x114   :  { %811 = vmatmul.f32.gmra.mxu3 %v734_v47  ;;  %852 = vmatmul.f32.gmra.mxu0 %v734_v47  ;;  %v2928_v62 = vpop.eup %2259  ;;  %v690_v6 = vmul.f32 %v2909_v56, %v689_v17 }
 0x115   :  { %893 = vmatmul.f32.gmra.mxu1 %v734_v47  ;;  %v703_v24 = vmul.f32 %v2928_v62, %v2903_v39  ;;  %158 = vrot.lane.b32.xlu0 %v2612_v53, %s2525_s4  ;;  %vm708_vm9 = vweird.f32 %v2928_v62  ;;  %v711_v53 = vand.u32 2147483647, %v2903_v39  ;;  %v729_v43 = vor.u32 1.1754944e-38, %v728_v40  ;;  %v1086_v40 = vld [vmem:[#allocation7 + $0x380] sm:$0xff] }
 0x116   :  { %v691_v13 = vadd.f32 %v2909_v56, %v690_v6  ;;  %vm709_vm11 = vmor %vm707_vm10, %vm708_vm9  ;;  %v1088_v6 = vld [vmem:[#allocation7 + $0x390] sm:$0xff] }
 0x117   :  { %v704_v46 = vsub.f32 1.0, %v703_v24  ;;  %vm712_vm12 = vcmp.eq.f32.partialorder %v711_v53, 8.507059e+37  ;;  %v1092_v53 = vld [vmem:[#allocation7 + $0x3b0] sm:$0xff] }
 0x118   :  { %v695_v28 = vsel %vm694_vm7, %v2909_v56, %v691_v13  ;;  %v726_v56 = vand.u32 2147483647, %v2924_v7  ;;  %v1107_v13 = vld [vmem:[#allocation7 + $0x428] sm:$0xff] }
 0x119   :  { %v2262_v23 = vpop.eup %2261  ;;  %v705_v51 = vmul.f32 %v2928_v62, %v704_v46  ;;  %v700_v50 = vsel %vm697_vm8, %v699_v63, %v695_v28  ;;  %v1108_v46 = vld [vmem:[#allocation7 + $0x430] sm:$0xff]  ;;  %1162 = vmatpush.msra.mxu3 %v1107_v13  ;;  %v1102_v28 = vld [vmem:[#allocation7 + $0x400] sm:$0xff] }
 0x11a   :  { %v718_v30 = vmul.f32 %v2262_v23, %v2924_v7  ;;  %v737_v10 = vmul.f32 %v700_v50, %v2839_v34  ;;  %1031 = vrot.lane.b32.xlu2 %v2974_v49, %s2525_s4  ;;  %vm723_vm13 = vweird.f32 %v2262_v23  ;;  %vm727_vm1 = vcmp.eq.f32.partialorder %v726_v56, 8.507059e+37  ;;  %v1100_v7 = vld [vmem:[#allocation7 + $0x3f0] sm:$0xff]  ;;  %v1098_v50 = vld [vmem:[#allocation7 + $0x3e0] sm:$0xff] }
 0x11b   :  { %v706_v31 = vadd.f32 %v2928_v62, %v705_v51  ;;  %vm724_vm15 = vmor %vm722_vm14, %vm723_vm13  ;;  %1163 = vmatpush.msra.mxu3 %v1104_v25  ;;  %v1082_v51 = vld [vmem:[#allocation7 + $0x360] sm:$0xff] }
 0x11c   :  { %814 = vmatmul.f32.gmra.mxu3 %v735_v5  ;;  %855 = vmatmul.f32.gmra.mxu0 %v735_v5  ;;  %v719_v32 = vsub.f32 1.0, %v718_v30 }
 0x11d   :  { %896 = vmatmul.f32.gmra.mxu1 %v735_v5  ;;  %v710_v21 = vsel %vm709_vm11, %v2928_v62, %v706_v31  ;;  %1035 = vrot.lane.b32.xlu0 %v2972_v33, %s2525_s4  ;;  %v1091_v62 = vld [vmem:[#allocation7 + $0x3a8] sm:$0xff]  ;;  %v1117_v5 = vld [vmem:[#allocation7 + $0x478] sm:$0xff] }
 0x11e   :  { %v720_v15 = vmul.f32 %v2262_v23, %v719_v32  ;;  %v715_v34 = vsel %vm712_vm12, %v714_v16, %v710_v21  ;;  %1200 = vmatpush.msra.mxu0 %v1117_v5  ;;  %1164 = vmatpush.msra.mxu3 %v1101_v29  ;;  %v1099_v31 = vld [vmem:[#allocation7 + $0x3e8] sm:$0xff]  ;;  %v1093_v21 = vld [vmem:[#allocation7 + $0x3b8] sm:$0xff]  ;;  %v149_v29 = vpop.permute.xlu1 %148 }
 0x11f   :  { %v738_v41 = vmul.f32 %v715_v34, %v2859_v35  ;;  %v1115_v35 = vld [vmem:[#allocation7 + $0x468] sm:$0xff]  ;;  %v1089_v16 = vld [vmem:[#allocation7 + $0x398] sm:$0xff]  ;;  %v1090_v34 = vld [vmem:[#allocation7 + $0x3a0] sm:$0xff] }
 0x120   :  { %v721_v39 = vadd.f32 %v2262_v23, %v720_v15  ;;  %1118 = vmatpush.msrb.mxu2 %v1115_v35  ;;  %1201 = vmatpush.msra.mxu0 %v1114_v54  ;;  %v1095_v32 = vld [vmem:[#allocation7 + $0x3c8] sm:$0xff]  ;;  %v1081_v35 = vld [vmem:[#allocation7 + $0x358] sm:$0xff] }
 0x121   :  { %1165 = vmatpush.msra.mxu3 %v1098_v50 }
 0x122   :  { %v725_v47 = vsel %vm724_vm15, %v2262_v23, %v721_v39  ;;  %160 = vrot.lane.b32.xlu2 %v2621_v55, %s2525_s4  ;;  %1119 = vmatpush.msrb.mxu2 %v1112_v59  ;;  %v1097_v55 = vld [vmem:[#allocation7 + $0x3d8] sm:$0xff]  ;;  %v1076_v39 = vld [vmem:[#allocation7 + $0x330] sm:$0xff]  ;;  %v1070_v59 = vld [vmem:[#allocation7 + $0x300] sm:$0xff] }
 0x123   :  { %v730_v52 = vsel %vm727_vm1, %v729_v43, %v725_v47  ;;  %1202 = vmatpush.msra.mxu0 %v1111_v42  ;;  %v1085_v23 = vld [vmem:[#allocation7 + $0x378] sm:$0xff]  ;;  %1166 = vmatpush.msra.mxu3 %v1095_v32  ;;  %v1083_v47 = vld [vmem:[#allocation7 + $0x368] sm:$0xff]  ;;  %v1084_v43 = vld [vmem:[#allocation7 + $0x370] sm:$0xff] }
 0x124   :  { %817 = vmatmul.f32.gmra.mxu3 %v736_v26  ;;  %858 = vmatmul.f32.gmra.mxu0 %v736_v26  ;;  %v739_v45 = vmul.f32 %v730_v52, %v2881_v19  ;;  %v1094_v19 = vld [vmem:[#allocation7 + $0x3c0] sm:$0xff]  ;;  %v1073_v52 = vld [vmem:[#allocation7 + $0x318] sm:$0xff] }
 0x125   :  { %899 = vmatmul.f32.gmra.mxu1 %v736_v26  ;;  %1120 = vmatpush.msrb.mxu2 %v1109_v61  ;;  %v1105_v26 = vld [vmem:[#allocation7 + $0x418] sm:$0xff] }
 0x126   :  { %1203 = vmatpush.msra.mxu0 %v1108_v46  ;;  %1167 = vmatpush.msra.mxu3 %v1092_v53  ;;  %v1077_v61 = vld [vmem:[#allocation7 + $0x338] sm:$0xff] }
 0x127   :  { %1121 = vmatpush.msrb.mxu2 %v1106_v60  ;;  %v1078_v60 = vld [vmem:[#allocation7 + $0x340] sm:$0xff] }
 0x128   :  { %1204 = vmatpush.msra.mxu0 %v1105_v26  ;;  %1168 = vmatpush.msra.mxu3 %v1089_v16  ;;  %v1005_v16 = vsel %vm129_vm0, %v2899_v22, 0.0 }
 0x129   :  { %1122 = vmatpush.msrb.mxu2 %v1103_v1 }
 0x12a   :  { %1205 = vmatpush.msra.mxu0 %v1102_v28  ;;  %1169 = vmatpush.msra.mxu3 %v1086_v40  ;;  %v3030_v40 = vld [vmem:[#allocation8 + $0x1] ss:$0 sm:$0xff] }
 0x12b   :  { %1123 = vmatpush.msrb.mxu2 %v1100_v7 }
 0x12c   :  { %820 = vmatmul.f32.gmra.mxu3 %v737_v10  ;;  %861 = vmatmul.f32.gmra.mxu0 %v737_v10 }
 0x12d   :  { %902 = vmatmul.f32.gmra.mxu1 %v737_v10  ;;  %1124 = vmatpush.msrb.mxu2 %v1097_v55  ;;  %v1079_v10 = vld [vmem:[#allocation7 + $0x348] sm:$0xff]  ;;  %v1074_v55 = vld [vmem:[#allocation7 + $0x320] sm:$0xff] }
 0x12e   :  { %1206 = vmatpush.msra.mxu0 %v1099_v31  ;;  %1170 = vmatpush.msra.mxu3 %v1083_v47 }
 0x12f   :  { %1125 = vmatpush.msrb.mxu2 %v1094_v19  ;;  %v1075_v19 = vld [vmem:[#allocation7 + $0x328] sm:$0xff] }
 0x130   :  { %1207 = vmatpush.msra.mxu0 %v1096_v37 }
 0x131   :  { %1126 = vmatpush.msrb.mxu2 %v1091_v62  ;;  %v1071_v62 = vld [vmem:[#allocation7 + $0x308] sm:$0xff] }
 0x132   :  { %1208 = vmatpush.msra.mxu0 %v1093_v21 }
 0x133   :  { %1127 = vmatpush.msrb.mxu2 %v1088_v6  ;;  %v147_v6 = vpop.permute.xlu0 %146 }
 0x134   :  { %823 = vmatmul.f32.gmra.mxu3 %v738_v41  ;;  %864 = vmatmul.f32.gmra.mxu0 %v738_v41 }
 0x135   :  { %905 = vmatmul.f32.gmra.mxu1 %v738_v41  ;;  %1128 = vmatpush.msrb.mxu2 %v1085_v23  ;;  %v1087_v41 = vld [vmem:[#allocation7 + $0x388] sm:$0xff] }
 0x136   :  { %1209 = vmatpush.msra.mxu0 %v1090_v34 }
 0x137   :  { %1129 = vmatpush.msrb.mxu2 %v1082_v51 }
 0x138   :  { %1210 = vmatpush.msra.mxu0 %v1087_v41 }
 0x139   :  { %1130 = vmatpush.msrb.mxu2 %v1079_v10 }
 0x13a   :  { %1211 = vmatpush.msra.mxu0 %v1084_v43 }
 0x13b   :  { %1131 = vmatpush.msrb.mxu2 %v1076_v39 }
 0x13c   :  { %826 = vmatmul.f32.gmra.mxu3 %v739_v45  ;;  %867 = vmatmul.f32.gmra.mxu0 %v739_v45 }
 0x13d   :  { %908 = vmatmul.f32.gmra.mxu1 %v739_v45  ;;  %1132 = vmatpush.msrb.mxu2 %v1073_v52  ;;  %v1080_v45 = vld [vmem:[#allocation7 + $0x350] sm:$0xff]  ;;  %v151_v52 = vpop.permute.xlu2 %150 }
 0x13e   :  { %1171 = vmatpush.msra.mxu3 %v1080_v45  ;;  %1212 = vmatpush.msra.mxu0 %v1081_v35 }
 0x13f   :  { %1133 = vmatpush.msrb.mxu2 %v1070_v59  ;;  %v170_v59 = vsel %vm129_vm0, %v147_v6, 0.0 }
 0x140   :  { %1172 = vmatpush.msra.mxu3 %v1077_v61  ;;  %1213 = vmatpush.msra.mxu0 %v1078_v60 }
 0x142   :  { %1173 = vmatpush.msra.mxu3 %v1074_v55  ;;  %1214 = vmatpush.msra.mxu0 %v1075_v19 }
 0x144   :  { %1174 = vmatpush.msra.mxu3 %v1071_v62  ;;  %1215 = vmatpush.msra.mxu0 %v1072_v3  ;;  %v171_v3 = vsel %vm129_vm0, %v149_v29, 0.0 }
 0x16c   :  { %v1024_v61 = vpop.permute.xlu1 %1023 }
 0x16e   :  { %v1022_v10 = vpop.permute.xlu0 %1021 }
 0x16f   :  { %v1045_v34 = vsel %vm129_vm0, %v1022_v10, 0.0  ;;  %v1007_v10 = vsel %vm129_vm0, %v2941_v27, 0.0 }
 0x170   :  { %v1053_v45 = vsub.f32 %v1005_v16, %v1045_v34 }
 0x174   :  { %v1028_v27 = vpop.permute.xlu1 %1027 }
 0x181   :  { %v847_v1 = vpop.f32.mrf.mxu0 }
 0x182   :  { %v2994_v30 = vpop.f32.mrf.mxu1 }
 0x187   :  { %v2988_v57 = vpop.f32.mrf.mxu3 }
 0x188   :  { %v912_v46 = vrot.slane %v2988_v57, 7  ;;  %v936_v57 = vrot.slane %v2994_v30, 1 }
 0x189   :  { %v850_v54 = vpop.f32.mrf.mxu0 }
 0x18a   :  { %v891_v56 = vpop.f32.mrf.mxu1 }
 0x18b   :  { %v937_v23 = vrot.slane %v891_v56, 1 }
 0x18f   :  { %v2990_v17 = vpop.f32.mrf.mxu3 }
 0x190   :  { %v913_v25 = vrot.slane %v2990_v17, 7 }
 0x191   :  { %v853_v28 = vpop.f32.mrf.mxu0 }
 0x192   :  { %v894_v5 = vpop.f32.mrf.mxu1  ;;  %v926_v17 = vsel %vm510_vm2, %v912_v46, %v913_v25 }
 0x193   :  { %v938_v42 = vrot.slane %v894_v5, 1  ;;  %v961_v39 = vadd.f32 %v926_v17, %v850_v54  ;;  %v1006_v5 = vsel %vm129_vm0, %v2876_v58, 0.0  ;;  %v1046_v54 = vsel %vm129_vm0, %v1024_v61, 0.0 }
 0x195   :  { %v949_v51 = vsel %vm535_vm4, %v937_v23, %v938_v42 }
 0x196   :  { %v953_v37 = vmul.f32 %v2708_v44, %v949_v51 }
 0x197   :  { %v2992_v24 = vpop.f32.mrf.mxu3 }
 0x198   :  { %v914_v50 = vrot.slane %v2992_v24, 7  ;;  %v950_v24 = vsel %vm535_vm4, %v936_v57, %v937_v23  ;;  %v969_v47 = vadd.f32 %v961_v39, %v953_v37  ;;  %v172_v37 = vsel %vm129_vm0, %v151_v52, 0.0  ;;  %v153_v39 = vpop.permute.xlu0 %152 }
 0x199   :  { %v856_v22 = vpop.f32.mrf.mxu0  ;;  %v173_v61 = vsel %vm129_vm0, %v153_v39, 0.0 }
 0x19a   :  { %v897_v8 = vpop.f32.mrf.mxu1  ;;  %v925_v21 = vsel %vm510_vm2, %v913_v25, %v914_v50  ;;  %v982_v55 = vadd.f32 %v3030_v40, %v969_v47  ;;  %v1054_v25 = vsub.f32 %v1006_v5, %v1046_v54 }
 0x19b   :  { %v930_v43 = vmul.f32 %v2697_v38, %v925_v21 }
 0x19c   :  { %v990_v23 = vsub.f32 %v171_v3, %v982_v55 }
 0x19d   :  { %v962_v19 = vadd.f32 %v930_v43, %v853_v28 }
 0x19e   :  { %v3056_v17 = vadd.f32 %v1054_v25, %v990_v23 }
 0x19f   :  { %v2996_v63 = vpop.f32.mrf.mxu3 }
 0x1a2   :  { %v3032_v41 = vpop.f32.mrf.mxu1 }
 0x1a7   :  { %v2998_v15 = vpop.f32.mrf.mxu3 }
 0x1a8   :  { %v916_v51 = vrot.slane %v2998_v15, 7 }
 0x1aa   :  { %v903_v28 = vpop.f32.mrf.mxu1 }
 0x1ab   :  { %v941_v47 = vrot.slane %v903_v28, 1  ;;  %v1009_v28 = vsel %vm129_vm0, %v2939_v9, 0.0 }
 0x1af   :  { %v3000_v7 = vpop.f32.mrf.mxu3 }
 0x1b0   :  { %v917_v55 = vrot.slane %v3000_v7, 7 }
 0x1b2   :  { %v922_v23 = vsel %vm510_vm2, %v916_v51, %v917_v55 }
 0x1b7   :  { %v3002_v11 = vpop.f32.mrf.mxu3 }
 0x1bf   :  { %v3004_v13 = vpop.f32.mrf.mxu3 }
 0x1c0   :  { %v919_v26 = vrot.slane %v3004_v13, 7  ;;  %v1011_v13 = vsel %vm129_vm0, %v2958_v48, 0.0 }
 0x1c2   :  { %v927_v31 = vsel %vm510_vm2, %v919_v26, %v912_v46  ;;  %v940_v46 = vrot.slane %v3032_v41, 1 }
 0x1c3   :  { %v928_v32 = vmul.f32 %v2728_v14, %v927_v31  ;;  %v1026_v31 = vpop.permute.xlu2 %1025 }
 0x1c5   :  { %v960_v53 = vadd.f32 %v928_v32, %v847_v1  ;;  %v939_v1 = vrot.slane %v897_v8, 1  ;;  %v915_v8 = vrot.slane %v2996_v63, 7 }
 0x1c7   :  { %v968_v56 = vadd.f32 %v960_v53, %v950_v24  ;;  %v948_v6 = vsel %vm535_vm4, %v938_v42, %v939_v1  ;;  %v947_v58 = vsel %vm535_vm4, %v939_v1, %v940_v46  ;;  %v924_v32 = vsel %vm510_vm2, %v914_v50, %v915_v8  ;;  %v859_v24 = vpop.f32.mrf.mxu0 }
 0x1c8   :  { %v970_v29 = vadd.f32 %v962_v19, %v948_v6  ;;  %v955_v63 = vmul.f32 %v2765_v4, %v947_v58  ;;  %v1047_v53 = vsel %vm129_vm0, %v1026_v31, 0.0  ;;  %v923_v15 = vsel %vm510_vm2, %v915_v8, %v916_v51  ;;  %v1030_v8 = vpop.permute.xlu0 %1029 }
 0x1c9   :  { %v981_v35 = vadd.f32 %v3030_v40, %v968_v56  ;;  %v963_v21 = vadd.f32 %v924_v32, %v856_v22  ;;  %v1055_v16 = vsub.f32 %v1007_v10, %v1047_v53  ;;  %v932_v34 = vmul.f32 %v2779_v18, %v923_v15  ;;  %v906_v56 = vpop.f32.mrf.mxu1 }
 0x1ca   :  { %v983_v42 = vadd.f32 %v3030_v40, %v970_v29  ;;  %v946_v1 = vsel %vm535_vm4, %v940_v46, %v941_v47  ;;  %v918_v6 = vrot.slane %v3002_v11, 7  ;;  %v1049_v58 = vsel %vm129_vm0, %v1030_v8, 0.0 }
 0x1cb   :  { %v989_v60 = vsub.f32 %v170_v59, %v981_v35  ;;  %v971_v41 = vadd.f32 %v963_v21, %v955_v63  ;;  %v1008_v35 = vsel %vm129_vm0, %v2918_v36, 0.0  ;;  %v1048_v59 = vsel %vm129_vm0, %v1028_v27, 0.0  ;;  %v155_v36 = vpop.permute.xlu2 %154  ;;  %v157_v63 = vpop.permute.xlu1 %156 }
 0x1cc   :  { %v991_v50 = vsub.f32 %v172_v37, %v983_v42  ;;  %v1056_v19 = vsub.f32 %v1008_v35, %v1048_v59  ;;  %v174_v29 = vsel %vm129_vm0, %v155_v36, 0.0  ;;  %v921_v11 = vsel %vm510_vm2, %v917_v55, %v918_v6 }
 0x1cd   :  { %v3038_v62 = vadd.f32 %v1053_v45, %v989_v60  ;;  %v984_v52 = vadd.f32 %v3030_v40, %v971_v41  ;;  %v964_v45 = vadd.f32 %v932_v34, %v859_v24  ;;  %v942_v60 = vrot.slane %v906_v56, 1 }
 0x1ce   :  { %v3070_v43 = vadd.f32 %v1055_v16, %v991_v50  ;;  %v1057_v32 = vsub.f32 %v1009_v28, %v1049_v58  ;;  %v934_v42 = vmul.f32 %v2811_v12, %v921_v11  ;;  %v1010_v16 = vsel %vm129_vm0, %v2974_v49, 0.0  ;;  %v1524_v28 = vld [vmem:[#allocation7 + $0x5e8] sm:$0xff]  ;;  %v1521_v58 = vld [vmem:[#allocation7 + $0x5d0] sm:$0xff]  ;;  %v1518_v11 = vld [vmem:[#allocation7 + $0x5b8] sm:$0xff] }
 0x1cf   :  { %1134 = vmatmul.f32.vlgmr.msrb.gmra.mxu2 %v3038_v62  ;;  %1175 = vmatmul.f32.vlgmr.msra.gmra.mxu3 %v3038_v62  ;;  %v862_v22 = vpop.f32.mrf.mxu0  ;;  %v992_v3 = vsub.f32 %v173_v61, %v984_v52  ;;  %v972_v5 = vadd.f32 %v964_v45, %v946_v1  ;;  %v945_v54 = vsel %vm535_vm4, %v941_v47, %v942_v60  ;;  %v175_v39 = vsel %vm129_vm0, %v157_v63, 0.0 }
 0x1d0   :  { %1216 = vmatmul.f32.vlgmr.msra.gmra.mxu0 %v3038_v62  ;;  %v957_v7 = vmul.f32 %v2807_v0, %v945_v54  ;;  %v965_v31 = vadd.f32 %v922_v23, %v862_v22  ;;  %v159_v47 = vpop.permute.xlu0 %158  ;;  %v920_v49 = vsel %vm510_vm2, %v918_v6, %v919_v26  ;;  %v1012_v6 = vsel %vm129_vm0, %v2972_v33, 0.0  ;;  %1527 = vmatpush.msra.mxu1 %v1524_v28  ;;  %v1511_v28 = vld [vmem:[#allocation7 + $0x580] sm:$0xff] }
 0x1d1   :  { %v3088_v25 = vadd.f32 %v1056_v19, %v992_v3  ;;  %v985_v46 = vadd.f32 %v3030_v40, %v972_v5  ;;  %v909_v10 = vpop.f32.mrf.mxu1  ;;  %v176_v1 = vsel %vm129_vm0, %v159_v47, 0.0  ;;  %v1526_v47 = vld [vmem:[#allocation7 + $0x5f8] sm:$0xff] }
 0x1d2   :  { %v973_v37 = vadd.f32 %v965_v31, %v957_v7  ;;  %v943_v24 = vrot.slane %v909_v10, 1  ;;  %1528 = vmatpush.msra.mxu1 %v1521_v58  ;;  %v1515_v31 = vld [vmem:[#allocation7 + $0x5a0] sm:$0xff]  ;;  %v1509_v10 = vld [vmem:[#allocation7 + $0x570] sm:$0xff]  ;;  %1609 = vmatpush.msrb.mxu3 %v1526_v47 }
 0x1d3   :  { %v993_v51 = vsub.f32 %v174_v29, %v985_v46  ;;  %v1032_v53 = vpop.permute.xlu2 %1031  ;;  %v1034_v45 = vpop.permute.xlu1 %1033  ;;  %v1497_v58 = vld [vmem:[#allocation7 + $0x510] sm:$0xff] }
 0x1d4   :  { %v986_v21 = vadd.f32 %v3030_v40, %v973_v37  ;;  %v1050_v34 = vsel %vm129_vm0, %v1032_v53, 0.0  ;;  %v944_v41 = vsel %vm535_vm4, %v942_v60, %v943_v24  ;;  %v951_v59 = vsel %vm535_vm4, %v943_v24, %v936_v57  ;;  %1529 = vmatpush.msra.mxu1 %v1518_v11  ;;  %v1512_v37 = vld [vmem:[#allocation7 + $0x588] sm:$0xff]  ;;  %v1507_v11 = vld [vmem:[#allocation7 + $0x560] sm:$0xff]  ;;  %v1505_v47 = vld [vmem:[#allocation7 + $0x550] sm:$0xff] }
 0x1d5   :  { %v3102_v15 = vadd.f32 %v1057_v32, %v993_v51  ;;  %v1058_v27 = vsub.f32 %v1010_v16, %v1050_v34  ;;  %v1051_v55 = vsel %vm129_vm0, %v1034_v45, 0.0  ;;  %v959_v26 = vmul.f32 %v2826_v20, %v951_v59  ;;  %v1522_v59 = vld [vmem:[#allocation7 + $0x5d8] sm:$0xff] }
 0x1d6   :  { %v994_v56 = vsub.f32 %v175_v39, %v986_v21  ;;  %v1059_v57 = vsub.f32 %v1011_v13, %v1051_v55  ;;  %1530 = vmatpush.msra.mxu1 %v1515_v31  ;;  %v1520_v13 = vld [vmem:[#allocation7 + $0x5c8] sm:$0xff] }
 0x1d7   :  { %1137 = vmatmul.f32.gmra.mxu2 %v3056_v17  ;;  %1178 = vmatmul.f32.gmra.mxu3 %v3056_v17  ;;  %v865_v9 = vpop.f32.mrf.mxu0  ;;  %v1508_v31 = vld [vmem:[#allocation7 + $0x568] sm:$0xff] }
 0x1d8   :  { %1219 = vmatmul.f32.gmra.mxu0 %v3056_v17  ;;  %v966_v50 = vadd.f32 %v934_v42, %v865_v9  ;;  %v3122_v61 = vadd.f32 %v1058_v27, %v994_v56  ;;  %v1036_v36 = vpop.permute.xlu0 %1035  ;;  %1531 = vmatpush.msra.mxu1 %v1512_v37  ;;  %v1525_v56 = vld [vmem:[#allocation7 + $0x5f0] sm:$0xff] }
 0x1d9   :  { %v1052_v8 = vsel %vm129_vm0, %v1036_v36, 0.0  ;;  %1568 = vmatpush.msra.mxu2 %v1525_v56  ;;  %v1517_v36 = vld [vmem:[#allocation7 + $0x5b0] sm:$0xff]  ;;  %v1504_v56 = vld [vmem:[#allocation7 + $0x548] sm:$0xff] }
 0x1da   :  { %v974_v52 = vadd.f32 %v966_v50, %v944_v41  ;;  %v1060_v46 = vsub.f32 %v1012_v6, %v1052_v8  ;;  %1532 = vmatpush.msra.mxu1 %v1509_v10  ;;  %v1513_v6 = vld [vmem:[#allocation7 + $0x590] sm:$0xff]  ;;  %v1514_v8 = vld [vmem:[#allocation7 + $0x598] sm:$0xff] }
 0x1db   :  { %v161_v3 = vpop.permute.xlu2 %160  ;;  %1569 = vmatpush.msra.mxu2 %v1522_v59  ;;  %v1501_v59 = vld [vmem:[#allocation7 + $0x530] sm:$0xff] }
 0x1dc   :  { %v987_v60 = vadd.f32 %v3030_v40, %v974_v52  ;;  %v177_v48 = vsel %vm129_vm0, %v161_v3, 0.0  ;;  %v1516_v3 = vld [vmem:[#allocation7 + $0x5a8] sm:$0xff] }
 0x1de   :  { %v995_v30 = vsub.f32 %v176_v1, %v987_v60  ;;  %v1523_v60 = vld [vmem:[#allocation7 + $0x5e0] sm:$0xff] }
 0x1df   :  { %1140 = vmatmul.f32.gmra.mxu2 %v3070_v43  ;;  %1181 = vmatmul.f32.gmra.mxu3 %v3070_v43  ;;  %v868_v35 = vpop.f32.mrf.mxu0  ;;  %v1519_v1 = vld [vmem:[#allocation7 + $0x5c0] sm:$0xff] }
 0x1e0   :  { %1222 = vmatmul.f32.gmra.mxu0 %v3070_v43  ;;  %v967_v22 = vadd.f32 %v920_v49, %v868_v35  ;;  %v3133_v5 = vadd.f32 %v1059_v57, %v995_v30  ;;  %1610 = vmatpush.msrb.mxu3 %v1523_v60  ;;  %v1503_v30 = vld [vmem:[#allocation7 + $0x540] sm:$0xff]  ;;  %v1502_v60 = vld [vmem:[#allocation7 + $0x538] sm:$0xff] }
 0x1e1   :  { %1570 = vmatpush.msra.mxu2 %v1519_v1  ;;  %v1488_v1 = vld [vmem:[#allocation7 + $0x4c8] sm:$0xff] }
 0x1e2   :  { %v975_v19 = vadd.f32 %v967_v22, %v959_v26  ;;  %v1506_v26 = vld [vmem:[#allocation7 + $0x558] sm:$0xff]  ;;  %1611 = vmatpush.msrb.mxu3 %v1520_v13 }
 0x1e3   :  { %1533 = vmatpush.msra.mxu1 %v1506_v26  ;;  %1571 = vmatpush.msra.mxu2 %v1516_v3  ;;  %v1499_v3 = vld [vmem:[#allocation7 + $0x520] sm:$0xff] }
 0x1e4   :  { %v988_v54 = vadd.f32 %v3030_v40, %v975_v19  ;;  %v3189_v19 = vld [vmem:[#allocation8 + $0x2] ss:$0 sm:$0xff]  ;;  %1612 = vmatpush.msrb.mxu3 %v1517_v36  ;;  %v1485_v36 = vld [vmem:[#allocation7 + $0x4b0] sm:$0xff] }
 0x1e5   :  { %1534 = vmatpush.msra.mxu1 %v1503_v30  ;;  %1572 = vmatpush.msra.mxu2 %v1513_v6  ;;  %v1498_v30 = vld [vmem:[#allocation7 + $0x518] sm:$0xff] }
 0x1e6   :  { %v996_v23 = vsub.f32 %v177_v48, %v988_v54  ;;  %v1500_v48 = vld [vmem:[#allocation7 + $0x528] sm:$0xff]  ;;  %1613 = vmatpush.msrb.mxu3 %v1514_v8 }
 0x1e7   :  { %1143 = vmatmul.f32.gmra.mxu2 %v3088_v25  ;;  %1184 = vmatmul.f32.gmra.mxu3 %v3088_v25 }
 0x1e8   :  { %1225 = vmatmul.f32.gmra.mxu0 %v3088_v25  ;;  %v3143_v7 = vadd.f32 %v1060_v46, %v996_v23  ;;  %1535 = vmatpush.msra.mxu1 %v1500_v48  ;;  %v1496_v48 = vld [vmem:[#allocation7 + $0x508] sm:$0xff] }
 0x1e9   :  { %1614 = vmatpush.msrb.mxu3 %v1511_v28 }
 0x1ea   :  { %1536 = vmatpush.msra.mxu1 %v1497_v58  ;;  %v1492_v58 = vld [vmem:[#allocation7 + $0x4e8] sm:$0xff] }
 0x1eb   :  { %1615 = vmatpush.msrb.mxu3 %v1508_v31  ;;  %v1479_v31 = vld [vmem:[#allocation7 + $0x480] sm:$0xff] }
 0x1ed   :  { %1616 = vmatpush.msrb.mxu3 %v1505_v47 }
 0x1ef   :  { %1146 = vmatmul.f32.gmra.mxu2 %v3102_v15  ;;  %1187 = vmatmul.f32.gmra.mxu3 %v3102_v15 }
 0x1f0   :  { %1228 = vmatmul.f32.gmra.mxu0 %v3102_v15  ;;  %1617 = vmatpush.msrb.mxu3 %v1502_v60 }
 0x1f2   :  { %1618 = vmatpush.msrb.mxu3 %v1499_v3 }
 0x1f4   :  { %1619 = vmatpush.msrb.mxu3 %v1496_v48 }
 0x1f7   :  { %1149 = vmatmul.f32.gmra.mxu2 %v3122_v61  ;;  %1190 = vmatmul.f32.gmra.mxu3 %v3122_v61 }
 0x1f8   :  { %1231 = vmatmul.f32.gmra.mxu0 %v3122_v61 }
 0x1ff   :  { %1152 = vmatmul.f32.gmra.mxu2 %v3133_v5  ;;  %1193 = vmatmul.f32.gmra.mxu3 %v3133_v5 }
 0x200   :  { %1234 = vmatmul.f32.gmra.mxu0 %v3133_v5 }
 0x207   :  { %1155 = vmatmul.f32.gmra.mxu2 %v3143_v7  ;;  %1196 = vmatmul.f32.gmra.mxu3 %v3143_v7 }
 0x208   :  { %1237 = vmatmul.f32.gmra.mxu0 %v3143_v7 }
 0x24d   :  { %v3150_v33 = vpop.f32.mrf.mxu0 }
 0x252   :  { %v3148_v40 = vpop.f32.mrf.mxu2  ;;  %v3156_v42 = vpop.f32.mrf.mxu3 }
 0x253   :  { %v1241_v39 = vrot.slane %v3148_v40, 7  ;;  %v1265_v40 = vrot.slane %v3150_v33, 1 }
 0x255   :  { %v3152_v51 = vpop.f32.mrf.mxu0 }
 0x256   :  { %v1266_v16 = vrot.slane %v3152_v51, 1 }
 0x258   :  { %v1279_v47 = vsel %vm535_vm4, %v1265_v40, %v1266_v16 }
 0x25a   :  { %v1138_v29 = vpop.f32.mrf.mxu2  ;;  %v1179_v53 = vpop.f32.mrf.mxu3 }
 0x25b   :  { %v1242_v34 = vrot.slane %v1138_v29, 7  ;;  %v1510_v29 = vld [vmem:[#allocation7 + $0x578] sm:$0xff] }
 0x25c   :  { %1573 = vmatpush.msra.mxu2 %v1510_v29 }
 0x25d   :  { %v3160_v9 = vpop.f32.mrf.mxu0  ;;  %v1255_v52 = vsel %vm510_vm2, %v1241_v39, %v1242_v34 }
 0x25e   :  { %v1267_v21 = vrot.slane %v3160_v9, 1  ;;  %v1290_v22 = vadd.f32 %v1255_v52, %v1179_v53  ;;  %1574 = vmatpush.msra.mxu2 %v1507_v11 }
 0x260   :  { %v1278_v41 = vsel %vm535_vm4, %v1266_v16, %v1267_v21  ;;  %1575 = vmatpush.msra.mxu2 %v1504_v56  ;;  %v1490_v56 = vld [vmem:[#allocation7 + $0x4d8] sm:$0xff] }
 0x261   :  { %v1282_v35 = vmul.f32 %v2708_v44, %v1278_v41 }
 0x262   :  { %v3154_v32 = vpop.f32.mrf.mxu2  ;;  %v1182_v45 = vpop.f32.mrf.mxu3  ;;  %1576 = vmatpush.msra.mxu2 %v1501_v59 }
 0x263   :  { %v1243_v49 = vrot.slane %v3154_v32, 7  ;;  %v1298_v54 = vadd.f32 %v1290_v22, %v1282_v35  ;;  %v1491_v35 = vld [vmem:[#allocation7 + $0x4e0] sm:$0xff]  ;;  %v1493_v32 = vld [vmem:[#allocation7 + $0x4f0] sm:$0xff] }
 0x264   :  { %1577 = vmatpush.msra.mxu2 %v1498_v30  ;;  %1620 = vmatpush.msrb.mxu3 %v1493_v32 }
 0x265   :  { %v3165_v50 = vpop.f32.mrf.mxu0  ;;  %v1254_v55 = vsel %vm510_vm2, %v1242_v34, %v1243_v49  ;;  %v3195_v37 = vadd.f32 %v3189_v19, %v1298_v54  ;;  %v1494_v34 = vld [vmem:[#allocation7 + $0x4f8] sm:$0xff]  ;;  %v1495_v54 = vld [vmem:[#allocation7 + $0x500] sm:$0xff] }
 0x266   :  { %v1259_v23 = vmul.f32 %v2697_v38, %v1254_v55  ;;  %v1268_v10 = vrot.slane %v3165_v50, 1  ;;  %1537 = vmatpush.msra.mxu1 %v1494_v34  ;;  %1578 = vmatpush.msra.mxu2 %v1495_v54 }
 0x267   :  { %v2146_v22 = vmul.f32 -1.442695, %v3195_v37  ;;  %1621 = vmatpush.msrb.mxu3 %v1490_v56 }
 0x268   :  { %v1291_v41 = vadd.f32 %v1259_v23, %v1182_v45  ;;  %v1277_v50 = vsel %vm535_vm4, %v1267_v21, %v1268_v10  ;;  %1538 = vmatpush.msra.mxu1 %v1491_v35  ;;  %v1482_v23 = vld [vmem:[#allocation7 + $0x498] sm:$0xff]  ;;  %1579 = vmatpush.msra.mxu2 %v1492_v58 }
 0x269   :  { %2263 = vpow2.f32 %v2146_v22  ;;  %v1486_v22 = vld [vmem:[#allocation7 + $0x4b8] sm:$0xff] }
 0x26a   :  { %v3158_v63 = vpop.f32.mrf.mxu2  ;;  %v1185_v53 = vpop.f32.mrf.mxu3  ;;  %v1299_v13 = vadd.f32 %v1291_v41, %v1277_v50  ;;  %1539 = vmatpush.msra.mxu1 %v1488_v1  ;;  %v1489_v41 = vld [vmem:[#allocation7 + $0x4d0] sm:$0xff]  ;;  %v1484_v1 = vld [vmem:[#allocation7 + $0x4a8] sm:$0xff] }
 0x26b   :  { %v1244_v45 = vrot.slane %v3158_v63, 7  ;;  %1580 = vmatpush.msra.mxu2 %v1489_v41 }
 0x26c   :  { %1540 = vmatpush.msra.mxu1 %v1485_v36  ;;  %v3228_v11 = vadd.f32 %v3189_v19, %v1299_v13  ;;  %v1481_v36 = vld [vmem:[#allocation7 + $0x490] sm:$0xff] }
 0x26d   :  { %v3187_v57 = vpop.f32.mrf.mxu0  ;;  %v1253_v6 = vsel %vm510_vm2, %v1243_v49, %v1244_v45  ;;  %1581 = vmatpush.msra.mxu2 %v1486_v22 }
 0x26e   :  { %v1269_v52 = vrot.slane %v3187_v57, 1  ;;  %1541 = vmatpush.msra.mxu1 %v1482_v23 }
 0x26f   :  { %v2264_v35 = vpop.eup %2263 }
 0x270   :  { %v1276_v9 = vsel %vm535_vm4, %v1268_v10, %v1269_v52  ;;  %v1292_v10 = vadd.f32 %v1253_v6, %v1185_v53  ;;  %v1487_v53 = vld [vmem:[#allocation7 + $0x4c0] sm:$0xff]  ;;  %1542 = vmatpush.msra.mxu1 %v1479_v31  ;;  %v3248_v30 = vadd.f32 1.0, %v2264_v35 }
 0x271   :  { %v1284_v29 = vmul.f32 %v2765_v4, %v1276_v9  ;;  %1622 = vmatpush.msrb.mxu3 %v1487_v53  ;;  %v1480_v9 = vld [vmem:[#allocation7 + $0x488] sm:$0xff] }
 0x272   :  { %v3162_v24 = vpop.f32.mrf.mxu2  ;;  %v1188_v49 = vpop.f32.mrf.mxu3  ;;  %vm1370_vm9 = vweird.f32 %v3248_v30 }
 0x273   :  { %v1245_v21 = vrot.slane %v3162_v24, 7  ;;  %v1300_v50 = vadd.f32 %v1292_v10, %v1284_v29  ;;  %1623 = vmatpush.msrb.mxu3 %v1484_v1 }
 0x275   :  { %v3205_v55 = vpop.f32.mrf.mxu0  ;;  %v3252_v48 = vadd.f32 %v3189_v19, %v1300_v50  ;;  %1624 = vmatpush.msrb.mxu3 %v1481_v36 }
 0x276   :  { %v1270_v16 = vrot.slane %v3205_v55, 1 }
 0x277   :  { %v2148_v58 = vmul.f32 -1.442695, %v3252_v48 }
 0x278   :  { %v1275_v55 = vsel %vm535_vm4, %v1269_v52, %v1270_v16 }
 0x27a   :  { %v3175_v27 = vpop.f32.mrf.mxu2  ;;  %v1191_v23 = vpop.f32.mrf.mxu3 }
 0x27d   :  { %v1235_v51 = vpop.f32.mrf.mxu0 }
 0x27e   :  { %v1271_v6 = vrot.slane %v1235_v51, 1 }
 0x280   :  { %v1274_v32 = vsel %vm535_vm4, %v1270_v16, %v1271_v6 }
 0x281   :  { %v1286_v52 = vmul.f32 %v2807_v0, %v1274_v32 }
 0x282   :  { %v3192_v46 = vpop.f32.mrf.mxu2  ;;  %v1194_v35 = vpop.f32.mrf.mxu3 }
 0x285   :  { %v1238_v56 = vpop.f32.mrf.mxu0 }
 0x286   :  { %v1272_v22 = vrot.slane %v1238_v56, 1 }
 0x288   :  { %v1273_v1 = vsel %vm535_vm4, %v1271_v6, %v1272_v22 }
 0x28a   :  { %v3207_v26 = vpop.f32.mrf.mxu2 }
 0x28b   :  { %v1248_v63 = vrot.slane %v3207_v26, 7  ;;  %v1280_v26 = vsel %vm535_vm4, %v1272_v22, %v1265_v40 }
 0x28c   :  { %v1288_v33 = vmul.f32 %v2826_v20, %v1280_v26 }
 0x28d   :  { %v1256_v8 = vsel %vm510_vm2, %v1248_v63, %v1241_v39  ;;  %v1252_v39 = vsel %vm510_vm2, %v1244_v45, %v1245_v21  ;;  %v1483_v45 = vld [vmem:[#allocation7 + $0x4a0] sm:$0xff] }
 0x28e   :  { %v1257_v28 = vmul.f32 %v2728_v14, %v1256_v8  ;;  %v1261_v59 = vmul.f32 %v2779_v18, %v1252_v39  ;;  %1582 = vmatpush.msra.mxu2 %v1483_v45  ;;  %v1246_v8 = vrot.slane %v3175_v27, 7 }
 0x290   :  { %v1289_v34 = vadd.f32 %v1257_v28, %v3156_v42  ;;  %v2147_v42 = vmul.f32 -1.442695, %v3228_v11  ;;  %v1293_v3 = vadd.f32 %v1261_v59, %v1188_v49  ;;  %1583 = vmatpush.msra.mxu2 %v1480_v9  ;;  %v1247_v28 = vrot.slane %v3192_v46, 7 }
 0x291   :  { %v1251_v57 = vsel %vm510_vm2, %v1245_v21, %v1246_v8 }
 0x292   :  { %v1297_v60 = vadd.f32 %v1289_v34, %v1279_v47  ;;  %2265 = vpow2.f32 %v2147_v42  ;;  %v1301_v29 = vadd.f32 %v1293_v3, %v1275_v55  ;;  %v1250_v39 = vsel %vm510_vm2, %v1246_v8, %v1247_v28 }
 0x293   :  { %v1294_v41 = vadd.f32 %v1251_v57, %v1191_v23  ;;  %v1263_v24 = vmul.f32 %v2811_v12, %v1250_v39  ;;  %v1249_v55 = vsel %vm510_vm2, %v1247_v28, %v1248_v63 }
 0x294   :  { %v3245_v13 = vadd.f32 %v3189_v19, %v1297_v60  ;;  %v3272_v46 = vadd.f32 %v3189_v19, %v1301_v29 }
 0x295   :  { %v1302_v47 = vadd.f32 %v1294_v41, %v1286_v52  ;;  %v1295_v53 = vadd.f32 %v1263_v24, %v1194_v35  ;;  %v1374_v35 = vand.u32 2147483647, %v3248_v30 }
 0x296   :  { %v2145_v54 = vmul.f32 -1.442695, %v3245_v13  ;;  %v2149_v21 = vmul.f32 -1.442695, %v3272_v46 }
 0x297   :  { %v3284_v42 = vadd.f32 %v3189_v19, %v1302_v47  ;;  %v1303_v9 = vadd.f32 %v1295_v53, %v1273_v1  ;;  %v3333_v1 = vld [vmem:[#allocation10 + $0xf0] sm:$0xff]  ;;  %vm1375_vm11 = vcmp.eq.f32.partialorder %v1374_v35, 8.507059e+37  ;;  %v3386_v35 = vld [vmem:[#allocation10 + $0xc0] sm:$0xff] }
 0x298   :  { %2267 = vpow2.f32 %v2145_v54  ;;  %v2266_v49 = vpop.eup %2265 }
 0x299   :  { %2269 = vrcp.f32 %v3248_v30  ;;  %v3274_v10 = vadd.f32 1.0, %v2266_v49  ;;  %v2150_v54 = vmul.f32 -1.442695, %v3284_v42  ;;  %v1197_v49 = vpop.f32.mrf.mxu3  ;;  %v3306_v63 = vadd.f32 %v3189_v19, %v1303_v9 }
 0x29a   :  { %2271 = vpow2.f32 %v2148_v58  ;;  %v1296_v28 = vadd.f32 %v1249_v55, %v1197_v49 }
 0x29b   :  { %vm1385_vm13 = vweird.f32 %v3274_v10 }
 0x29e   :  { %v2268_v27 = vpop.eup %2267 }
 0x29f   :  { %v1342_v31 = vadd.f32 1.0, %v2268_v27  ;;  %v3276_v34 = vpop.eup %2269 }
 0x2a0   :  { %v1366_v59 = vmul.f32 %v3276_v34, %v3248_v30  ;;  %v2272_v60 = vpop.eup %2271  ;;  %vm1371_vm7 = vweird.f32 %v3276_v34 }
 0x2a1   :  { %2273 = vrcp.f32 %v1342_v31  ;;  %v3286_v45 = vadd.f32 1.0, %v2272_v60  ;;  %v1361_v8 = vand.u32 2147483648, %v1342_v31  ;;  %v1359_v6 = vand.u32 2147483647, %v1342_v31  ;;  %vm3320_vm10 = vmor %vm1370_vm9, %vm1371_vm7 }
 0x2a2   :  { %2275 = vrcp.f32 %v3274_v10  ;;  %v1367_v51 = vsub.f32 1.0, %v1366_v59  ;;  %vm1355_vm5 = vweird.f32 %v1342_v31  ;;  %v2151_v59 = vmul.f32 -1.442695, %v3306_v63 }
 0x2a3   :  { %2277 = vpow2.f32 %v2149_v21  ;;  %v1362_v27 = vor.u32 1.1754944e-38, %v1361_v8  ;;  %vm1360_vm8 = vcmp.eq.f32.partialorder %v1359_v6, 8.507059e+37  ;;  %v1304_v21 = vadd.f32 %v1296_v28, %v1288_v33  ;;  %v3354_v6 = vld [vmem:[#allocation10 + $0xe0] sm:$0xff] }
 0x2a4   :  { %v1368_v23 = vmul.f32 %v3276_v34, %v1367_v51  ;;  %2279 = vrcp.f32 %v3286_v45  ;;  %v3331_v51 = vld [vmem:[#allocation10 + $0xf8] sm:$0xff] }
 0x2a5   :  { %2281 = vpow2.f32 %v2150_v54  ;;  %2178 = vmatpush.msrb.mxu1 %v3331_v51 }
 0x2a6   :  { %v1369_v52 = vadd.f32 %v3276_v34, %v1368_v23 }
 0x2a7   :  { %v2274_v50 = vpop.eup %2273  ;;  %2179 = vmatpush.msrb.mxu1 %v3333_v1 }
 0x2a8   :  { %v1351_v16 = vmul.f32 %v2274_v50, %v1342_v31  ;;  %v3290_v3 = vpop.eup %2275  ;;  %vm1356_vm3 = vweird.f32 %v2274_v50  ;;  %v1376_v31 = vand.u32 2147483648, %v3248_v30  ;;  %v1373_v53 = vsel %vm3320_vm10, %v3276_v34, %v1369_v52  ;;  %v3339_v34 = vld [vmem:[#allocation10 + $0xe8] sm:$0xff] }
 0x2a9   :  { %v2278_v29 = vpop.eup %2277  ;;  %v1381_v32 = vmul.f32 %v3290_v3, %v3274_v10  ;;  %vm1357_vm6 = vmor %vm1355_vm5, %vm1356_vm3  ;;  %vm1386_vm12 = vweird.f32 %v3290_v3  ;;  %2180 = vmatpush.msrb.mxu1 %v3339_v34  ;;  %vm1400_vm3 = vweird.f32 %v3286_v45 }
 0x2aa   :  { %v1352_v36 = vsub.f32 1.0, %v1351_v16  ;;  %v3310_v39 = vadd.f32 1.0, %v2278_v29  ;;  %v3313_v24 = vpop.eup %2279  ;;  %v1377_v30 = vor.u32 1.1754944e-38, %v1376_v31  ;;  %v3336_v16 = vadd.f32 %v3189_v19, %v1304_v21  ;;  %vm3356_vm14 = vmor %vm1385_vm13, %vm1386_vm12 }
 0x2ab   :  { %v1382_v40 = vsub.f32 1.0, %v1381_v32  ;;  %v2282_v22 = vpop.eup %2281  ;;  %v1391_v19 = vand.u32 2147483648, %v3274_v10  ;;  %2181 = vmatpush.msrb.mxu1 %v3354_v6  ;;  %vm1401_vm1 = vweird.f32 %v3313_v24  ;;  %v1406_v31 = vand.u32 2147483648, %v3286_v45  ;;  %v3419_v32 = vld [vmem:[#allocation10 + $0xa0] sm:$0xff] }
 0x2ac   :  { %v1353_v58 = vmul.f32 %v2274_v50, %v1352_v36  ;;  %2283 = vrcp.f32 %v3310_v39  ;;  %v1378_v9 = vsel %vm1375_vm11, %v1377_v30, %v1373_v53  ;;  %v3341_v36 = vadd.f32 1.0, %v2282_v22  ;;  %vm3388_vm5 = vmor %vm1400_vm3, %vm1401_vm1 }
 0x2ad   :  { %2285 = vpow2.f32 %v2151_v59  ;;  %v2152_v23 = vmul.f32 -1.442695, %v3336_v16  ;;  %v1471_v29 = vmul.f32 %v1378_v9, %v3195_v37  ;;  %v1392_v28 = vor.u32 1.1754944e-38, %v1391_v19  ;;  %v3442_v59 = vld [vmem:[#allocation10 + $0x80] sm:$0xff] }
 0x2ae   :  { %v1354_v57 = vadd.f32 %v2274_v50, %v1353_v58  ;;  %v1389_v58 = vand.u32 2147483647, %v3274_v10  ;;  %2287 = vrcp.f32 %v3341_v36  ;;  %v1407_v53 = vor.u32 1.1754944e-38, %v1406_v31 }
 0x2af   :  { %2289 = vpow2.f32 %v2152_v23  ;;  %v1421_v23 = vand.u32 2147483648, %v3310_v39  ;;  %v1436_v31 = vand.u32 2147483648, %v3341_v36  ;;  %vm1430_vm12 = vweird.f32 %v3341_v36 }
 0x2b0   :  { %v1358_v41 = vsel %vm1357_vm6, %v2274_v50, %v1354_v57  ;;  %v1383_v50 = vmul.f32 %v3290_v3, %v1382_v40  ;;  %v3368_v57 = vld [vmem:[#allocation10 + $0xd8] sm:$0xff]  ;;  %vm1390_vm15 = vcmp.eq.f32.partialorder %v1389_v58, 8.507059e+37  ;;  %v3377_v40 = vld [vmem:[#allocation10 + $0xc8] sm:$0xff]  ;;  %v1419_v58 = vand.u32 2147483647, %v3310_v39 }
 0x2b1   :  { %v1363_v56 = vsel %vm1360_vm8, %v1362_v27, %v1358_v41  ;;  %v3370_v27 = vld [vmem:[#allocation10 + $0xd0] sm:$0xff]  ;;  %2182 = vmatpush.msrb.mxu1 %v3368_v57  ;;  %vm1415_vm8 = vweird.f32 %v3310_v39 }
 0x2b2   :  { %v1470_v47 = vmul.f32 %v1363_v56, %v3245_v13  ;;  %v1396_v13 = vmul.f32 %v3313_v24, %v3286_v45  ;;  %v1384_v54 = vadd.f32 %v3290_v3, %v1383_v50  ;;  %v3346_v8 = vpop.eup %2283  ;;  %v3401_v50 = vld [vmem:[#allocation10 + $0xb8] sm:$0xff]  ;;  %vm1420_vm10 = vcmp.eq.f32.partialorder %v1419_v58, 8.507059e+37 }
 0x2b3   :  { %v2286_v26 = vpop.eup %2285  ;;  %v1411_v10 = vmul.f32 %v3346_v8, %v3310_v39  ;;  %2183 = vmatpush.msrb.mxu1 %v3370_v27  ;;  %vm1416_vm7 = vweird.f32 %v3346_v8  ;;  %v3428_v39 = vld [vmem:[#allocation10 + $0x98] sm:$0xff] }
 0x2b4   :  { %1543 = vmatmul.f32.vlgmr.msra.gmra.mxu1 %v1470_v47  ;;  %1584 = vmatmul.f32.vlgmr.msra.gmra.mxu2 %v1470_v47  ;;  %v1397_v55 = vsub.f32 1.0, %v1396_v13  ;;  %v1388_v37 = vsel %vm3356_vm14, %v3290_v3, %v1384_v54  ;;  %v3373_v33 = vadd.f32 1.0, %v2286_v26  ;;  %v3379_v56 = vpop.eup %2287  ;;  %v3403_v13 = vld [vmem:[#allocation10 + $0xb0] sm:$0xff]  ;;  %vm1417_vm9 = vmor %vm1415_vm8, %vm1416_vm7 }
 0x2b5   :  { %1625 = vmatmul.f32.vlgmr.msrb.gmra.mxu3 %v1470_v47  ;;  %v1393_v52 = vsel %vm1390_vm15, %v1392_v28, %v1388_v37  ;;  %v1412_v41 = vsub.f32 1.0, %v1411_v10  ;;  %v1404_v47 = vand.u32 2147483647, %v3286_v45  ;;  %2184 = vmatpush.msrb.mxu1 %v3377_v40  ;;  %v2290_v60 = vpop.eup %2289  ;;  %v1426_v45 = vmul.f32 %v3379_v56, %v3341_v36  ;;  %v3430_v10 = vld [vmem:[#allocation10 + $0x90] sm:$0xff] }
 0x2b6   :  { %v1398_v49 = vmul.f32 %v3313_v24, %v1397_v55  ;;  %v1472_v21 = vmul.f32 %v1393_v52, %v3228_v11  ;;  %2291 = vrcp.f32 %v3373_v33  ;;  %v3405_v30 = vadd.f32 1.0, %v2290_v60  ;;  %v3410_v55 = vld [vmem:[#allocation10 + $0xa8] sm:$0xff] }
 0x2b7   :  { %v1413_v22 = vmul.f32 %v3346_v8, %v1412_v41  ;;  %2185 = vmatpush.msrb.mxu1 %v3386_v35  ;;  %vm1405_vm6 = vcmp.eq.f32.partialorder %v1404_v47, 8.507059e+37  ;;  %v1427_v54 = vsub.f32 1.0, %v1426_v45  ;;  %vm1431_vm11 = vweird.f32 %v3379_v56 }
 0x2b8   :  { %v1399_v3 = vadd.f32 %v3313_v24, %v1398_v49  ;;  %2293 = vrcp.f32 %v3405_v30  ;;  %v1422_v49 = vor.u32 1.1754944e-38, %v1421_v23  ;;  %v1434_v47 = vand.u32 2147483647, %v3341_v36  ;;  %vm1432_vm13 = vmor %vm1430_vm12, %vm1431_vm11 }
 0x2b9   :  { %2186 = vmatpush.msrb.mxu1 %v3401_v50  ;;  %v1428_v37 = vmul.f32 %v3379_v56, %v1427_v54  ;;  %v1437_v45 = vor.u32 1.1754944e-38, %v1436_v31  ;;  %vm1445_vm1 = vweird.f32 %v3373_v33  ;;  %vm1460_vm7 = vweird.f32 %v3405_v30  ;;  %v1741_v31 = vld [vmem:[#allocation10 + $0x30] sm:$0xff] }
 0x2ba   :  { %v1403_v11 = vsel %vm3388_vm5, %v3313_v24, %v1399_v3  ;;  %v1414_v24 = vadd.f32 %v3346_v8, %v1413_v22  ;;  %v3435_v3 = vld [vmem:[#allocation10 + $0x88] sm:$0xff]  ;;  %vm1435_vm14 = vcmp.eq.f32.partialorder %v1434_v47, 8.507059e+37  ;;  %v1739_v47 = vld [vmem:[#allocation10 + $0x20] sm:$0xff] }
 0x2bb   :  { %v1408_v9 = vsel %vm1405_vm6, %v1407_v53, %v1403_v11  ;;  %2187 = vmatpush.msrb.mxu1 %v3403_v13  ;;  %v1429_v52 = vadd.f32 %v3379_v56, %v1428_v37  ;;  %v1466_v37 = vand.u32 2147483648, %v3405_v30 }
 0x2bc   :  { %1546 = vmatmul.f32.gmra.mxu1 %v1471_v29  ;;  %1587 = vmatmul.f32.gmra.mxu2 %v1471_v29  ;;  %v3412_v19 = vpop.eup %2291  ;;  %v1418_v26 = vsel %vm1417_vm9, %v3346_v8, %v1414_v24 }
 0x2bd   :  { %1628 = vmatmul.f32.gmra.mxu3 %v1471_v29  ;;  %v1473_v29 = vmul.f32 %v1408_v9, %v3252_v48  ;;  %2188 = vmatpush.msrb.mxu1 %v3410_v55  ;;  %v1441_v48 = vmul.f32 %v3412_v19, %v3373_v33  ;;  %v1423_v28 = vsel %vm1420_vm10, %v1422_v49, %v1418_v26  ;;  %vm1446_vm15 = vweird.f32 %v3412_v19 }
 0x2be   :  { %v2294_v41 = vpop.eup %2293  ;;  %v1433_v60 = vsel %vm1432_vm13, %v3379_v56, %v1429_v52  ;;  %v1451_v9 = vand.u32 2147483648, %v3373_v33  ;;  %v1449_v56 = vand.u32 2147483647, %v3373_v33  ;;  %vm1447_vm3 = vmor %vm1445_vm1, %vm1446_vm15  ;;  %v1464_v33 = vand.u32 2147483647, %v3405_v30  ;;  %v1747_v52 = vld [vmem:[#allocation10 + $0x60] sm:$0xff] }
 0x2bf   :  { %2189 = vmatpush.msrb.mxu1 %v3419_v32  ;;  %v1442_v8 = vsub.f32 1.0, %v1441_v48  ;;  %v1456_v22 = vmul.f32 %v2294_v41, %v3405_v30  ;;  %vm1461_vm6 = vweird.f32 %v2294_v41  ;;  %v1749_v30 = vld [vmem:[#allocation10 + $0x70] sm:$0xff] }
 0x2c0   :  { %vm1450_vm5 = vcmp.eq.f32.partialorder %v1449_v56, 8.507059e+37  ;;  %vm1462_vm8 = vmor %vm1460_vm7, %vm1461_vm6  ;;  %vm1465_vm9 = vcmp.eq.f32.partialorder %v1464_v33, 8.507059e+37 }
 0x2c1   :  { %2190 = vmatpush.msrb.mxu1 %v3428_v39  ;;  %v1443_v11 = vmul.f32 %v3412_v19, %v1442_v8  ;;  %v1457_v53 = vsub.f32 1.0, %v1456_v22  ;;  %v1746_v8 = vld [vmem:[#allocation10 + $0x58] sm:$0xff] }
 0x2c2   :  { %v1738_v22 = vld [vmem:[#allocation10 + $0x18] sm:$0xff] }
 0x2c3   :  { %2191 = vmatpush.msrb.mxu1 %v3430_v10  ;;  %v1444_v36 = vadd.f32 %v3412_v19, %v1443_v11  ;;  %v1458_v23 = vmul.f32 %v2294_v41, %v1457_v53  ;;  %v1735_v53 = vld [vmem:[#allocation10] sm:$0xff] }
 0x2c4   :  { %1549 = vmatmul.f32.gmra.mxu1 %v1472_v21  ;;  %1590 = vmatmul.f32.gmra.mxu2 %v1472_v21 }
 0x2c5   :  { %1631 = vmatmul.f32.gmra.mxu3 %v1472_v21  ;;  %v1474_v21 = vmul.f32 %v1423_v28, %v3272_v46  ;;  %2192 = vmatpush.msrb.mxu1 %v3435_v3  ;;  %v1438_v46 = vsel %vm1435_vm14, %v1437_v45, %v1433_v60  ;;  %v1448_v54 = vsel %vm1447_vm3, %v3412_v19, %v1444_v36  ;;  %v1467_v19 = vor.u32 1.1754944e-38, %v1466_v37  ;;  %v1736_v36 = vld [vmem:[#allocation10 + $0x8] sm:$0xff] }
 0x2c6   :  { %v1475_v24 = vmul.f32 %v1438_v46, %v3284_v42  ;;  %v1459_v26 = vadd.f32 %v2294_v41, %v1458_v23  ;;  %v1737_v46 = vld [vmem:[#allocation10 + $0x10] sm:$0xff] }
 0x2c7   :  { %2193 = vmatpush.msrb.mxu1 %v3442_v59 }
 0x2c8   :  { %v1463_v48 = vsel %vm1462_vm8, %v2294_v41, %v1459_v26  ;;  %v1742_v41 = vld [vmem:[#allocation10 + $0x38] sm:$0xff] }
 0x2c9   :  { %v1468_v49 = vsel %vm1465_vm9, %v1467_v19, %v1463_v48  ;;  %v3515_v48 = vld [vmem:[#allocation8 + $0x3] ss:$0 sm:$0xff] }
 0x2ca   :  { %v1477_v28 = vmul.f32 %v1468_v49, %v3336_v16  ;;  %v1748_v16 = vld [vmem:[#allocation10 + $0x68] sm:$0xff]  ;;  %v2327_v49 = vld [vmem:[#allocation2] sm:$0xff] }
 0x2cc   :  { %1552 = vmatmul.f32.gmra.mxu1 %v1473_v29  ;;  %1593 = vmatmul.f32.gmra.mxu2 %v1473_v29 }
 0x2cd   :  { %1634 = vmatmul.f32.gmra.mxu3 %v1473_v29  ;;  %v1452_v29 = vor.u32 1.1754944e-38, %v1451_v9 }
 0x2cf   :  { %v1453_v58 = vsel %vm1450_vm5, %v1452_v29, %v1448_v54 }
 0x2d0   :  { %v1476_v42 = vmul.f32 %v1453_v58, %v3306_v63  ;;  %v1750_v63 = vld [vmem:[#allocation10 + $0x78] sm:$0xff] }
 0x2d1   :  { %1771 = vmatpush.msrb.mxu0 %v1750_v63 }
 0x2d3   :  { %1772 = vmatpush.msrb.mxu0 %v1749_v30 }
 0x2d4   :  { %1555 = vmatmul.f32.gmra.mxu1 %v1474_v21  ;;  %1596 = vmatmul.f32.gmra.mxu2 %v1474_v21 }
 0x2d5   :  { %1637 = vmatmul.f32.gmra.mxu3 %v1474_v21  ;;  %1773 = vmatpush.msrb.mxu0 %v1748_v16  ;;  %v1740_v21 = vld [vmem:[#allocation10 + $0x28] sm:$0xff] }
 0x2d7   :  { %1774 = vmatpush.msrb.mxu0 %v1747_v52 }
 0x2d9   :  { %1775 = vmatpush.msrb.mxu0 %v1746_v8 }
 0x2dc   :  { %1558 = vmatmul.f32.gmra.mxu1 %v1475_v24  ;;  %1599 = vmatmul.f32.gmra.mxu2 %v1475_v24 }
 0x2dd   :  { %1640 = vmatmul.f32.gmra.mxu3 %v1475_v24 }
 0x2e4   :  { %1561 = vmatmul.f32.gmra.mxu1 %v1476_v42  ;;  %1602 = vmatmul.f32.gmra.mxu2 %v1476_v42 }
 0x2e5   :  { %1643 = vmatmul.f32.gmra.mxu3 %v1476_v42 }
 0x2ec   :  { %1564 = vmatmul.f32.gmra.mxu1 %v1477_v28  ;;  %1605 = vmatmul.f32.gmra.mxu2 %v1477_v28 }
 0x2ed   :  { %1646 = vmatmul.f32.gmra.mxu3 %v1477_v28 }
 0x2f4   :  { %1834 = vmatmul.f32.vlgmr.msrb.gmra.mxu1 %v3070_v43  ;;  %v1745_v43 = vld [vmem:[#allocation10 + $0x50] sm:$0xff] }
 0x2f5   :  { %1776 = vmatpush.msrb.mxu0 %v1745_v43 }
 0x2fc   :  { %1837 = vmatmul.f32.gmra.mxu1 %v3088_v25 }
 0x304   :  { %1840 = vmatmul.f32.gmra.mxu1 %v3102_v15  ;;  %v1744_v15 = vld [vmem:[#allocation10 + $0x48] sm:$0xff] }
 0x305   :  { %1777 = vmatpush.msrb.mxu0 %v1744_v15 }
 0x30c   :  { %1843 = vmatmul.f32.gmra.mxu1 %v3122_v61  ;;  %v1743_v61 = vld [vmem:[#allocation10 + $0x40] sm:$0xff] }
 0x30d   :  { %1778 = vmatpush.msrb.mxu0 %v1743_v61  ;;  %v2328_v61 = vld [vmem:[#allocation2 + $0x8] sm:$0xff] }
 0x30f   :  { %1779 = vmatpush.msrb.mxu0 %v1742_v41 }
 0x311   :  { %1780 = vmatpush.msrb.mxu0 %v1741_v31 }
 0x313   :  { %1781 = vmatpush.msrb.mxu0 %v1740_v21 }
 0x314   :  { %1846 = vmatmul.f32.gmra.mxu1 %v3133_v5 }
 0x315   :  { %1782 = vmatpush.msrb.mxu0 %v1739_v47 }
 0x317   :  { %1783 = vmatpush.msrb.mxu0 %v1738_v22 }
 0x319   :  { %1784 = vmatpush.msrb.mxu0 %v1737_v46 }
 0x31b   :  { %1785 = vmatpush.msrb.mxu0 %v1736_v36 }
 0x31c   :  { %1849 = vmatmul.f32.gmra.mxu1 %v3143_v7 }
 0x31d   :  { %1786 = vmatpush.msrb.mxu0 %v1735_v53  ;;  %v2329_v53 = vld [vmem:[#allocation2 + $0x10] sm:$0xff] }
 0x31f   :  { %1812 = vmatpush.msra.mxu0 %v3331_v51 }
 0x321   :  { %1813 = vmatpush.msra.mxu0 %v3333_v1 }
 0x323   :  { %1814 = vmatpush.msra.mxu0 %v3339_v34 }
 0x325   :  { %1815 = vmatpush.msra.mxu0 %v3354_v6 }
 0x327   :  { %1816 = vmatpush.msra.mxu0 %v3368_v57 }
 0x329   :  { %1817 = vmatpush.msra.mxu0 %v3370_v27 }
 0x32b   :  { %1818 = vmatpush.msra.mxu0 %v3377_v40 }
 0x32d   :  { %1819 = vmatpush.msra.mxu0 %v3386_v35 }
 0x32f   :  { %1820 = vmatpush.msra.mxu0 %v3401_v50 }
 0x331   :  { %v3467_v25 = vpop.f32.mrf.mxu1  ;;  %1821 = vmatpush.msra.mxu0 %v3403_v13 }
 0x332   :  { %v1650_v34 = vrot.slane %v3467_v25, 7 }
 0x333   :  { %1822 = vmatpush.msra.mxu0 %v3410_v55 }
 0x335   :  { %1823 = vmatpush.msra.mxu0 %v3419_v32  ;;  %v130_v32 = vsel %vm129_vm0, %v2327_v49, 0.0  ;;  %v2331_v49 = vld [vmem:[#allocation2 + $0x20] sm:$0xff] }
 0x337   :  { %v1585_v56 = vpop.f32.mrf.mxu2  ;;  %1824 = vmatpush.msra.mxu0 %v3428_v39 }
 0x338   :  { %v3475_v11 = vpop.f32.mrf.mxu3 }
 0x339   :  { %v3469_v5 = vpop.f32.mrf.mxu1  ;;  %v1674_v35 = vrot.slane %v3475_v11, 1  ;;  %1825 = vmatpush.msra.mxu0 %v3430_v10 }
 0x33a   :  { %v1651_v50 = vrot.slane %v3469_v5, 7  ;;  %v131_v5 = vsel %vm129_vm0, %v2328_v61, 0.0 }
 0x33b   :  { %1826 = vmatpush.msra.mxu0 %v3435_v3 }
 0x33c   :  { %v1664_v19 = vsel %vm510_vm2, %v1650_v34, %v1651_v50 }
 0x33d   :  { %1827 = vmatpush.msra.mxu0 %v3442_v59 }
 0x33f   :  { %v1588_v29 = vpop.f32.mrf.mxu2 }
 0x340   :  { %v1629_v9 = vpop.f32.mrf.mxu3  ;;  %v1699_v28 = vadd.f32 %v1664_v19, %v1588_v29 }
 0x341   :  { %v3471_v7 = vpop.f32.mrf.mxu1  ;;  %v1675_v57 = vrot.slane %v1629_v9, 1  ;;  %v132_v9 = vsel %vm129_vm0, %v2329_v53, 0.0 }
 0x342   :  { %v1652_v55 = vrot.slane %v3471_v7, 7 }
 0x343   :  { %v1688_v42 = vsel %vm535_vm4, %v1674_v35, %v1675_v57 }
 0x344   :  { %v1663_v39 = vsel %vm510_vm2, %v1651_v50, %v1652_v55 }
 0x345   :  { %v1668_v8 = vmul.f32 %v2697_v38, %v1663_v39 }
 0x347   :  { %v1591_v26 = vpop.f32.mrf.mxu2 }
 0x348   :  { %v1632_v54 = vpop.f32.mrf.mxu3  ;;  %v1700_v41 = vadd.f32 %v1668_v8, %v1591_v26  ;;  %v2332_v8 = vld [vmem:[#allocation2 + $0x28] sm:$0xff] }
 0x349   :  { %v3473_v60 = vpop.f32.mrf.mxu1  ;;  %v1676_v6 = vrot.slane %v1632_v54, 1 }
 0x34a   :  { %v1653_v21 = vrot.slane %v3473_v60, 7 }
 0x34b   :  { %v1687_v37 = vsel %vm535_vm4, %v1675_v57, %v1676_v6 }
 0x34c   :  { %v1662_v46 = vsel %vm510_vm2, %v1652_v55, %v1653_v21 }
 0x34f   :  { %v1594_v43 = vpop.f32.mrf.mxu2 }
 0x350   :  { %v1635_v51 = vpop.f32.mrf.mxu3 }
 0x351   :  { %v3477_v45 = vpop.f32.mrf.mxu1  ;;  %v1677_v52 = vrot.slane %v1635_v51, 1 }
 0x352   :  { %v1654_v59 = vrot.slane %v3477_v45, 7 }
 0x353   :  { %v1686_v25 = vsel %vm535_vm4, %v1676_v6, %v1677_v52 }
 0x354   :  { %v1708_v7 = vadd.f32 %v1700_v41, %v1686_v25  ;;  %v1661_v60 = vsel %vm510_vm2, %v1653_v21, %v1654_v59 }
 0x355   :  { %v1670_v45 = vmul.f32 %v2779_v18, %v1661_v60  ;;  %v2024_v60 = vld [vmem:[#allocation11 + $0x58] sm:$0xff] }
 0x356   :  { %v1721_v22 = vadd.f32 %v3515_v48, %v1708_v7 }
 0x357   :  { %v1597_v36 = vpop.f32.mrf.mxu2 }
 0x358   :  { %v1638_v63 = vpop.f32.mrf.mxu3  ;;  %v1729_v54 = vadd.f32 %v1721_v22, %v132_v9  ;;  %v1702_v50 = vadd.f32 %v1670_v45, %v1597_v36  ;;  %v2027_v36 = vld [vmem:[#allocation11 + $0x70] sm:$0xff]  ;;  %v2026_v9 = vld [vmem:[#allocation11 + $0x68] sm:$0xff] }
 0x359   :  { %v3480_v24 = vpop.f32.mrf.mxu1  ;;  %v1678_v15 = vrot.slane %v1638_v63, 1  ;;  %v2022_v45 = vld [vmem:[#allocation11 + $0x48] sm:$0xff] }
 0x35b   :  { %v1685_v38 = vsel %vm535_vm4, %v1677_v52, %v1678_v15 }
 0x35c   :  { %v1693_v47 = vmul.f32 %v2765_v4, %v1685_v38 }
 0x35f   :  { %v1600_v26 = vpop.f32.mrf.mxu2 }
 0x360   :  { %v1641_v3 = vpop.f32.mrf.mxu3 }
 0x361   :  { %v3486_v23 = vpop.f32.mrf.mxu1  ;;  %v1679_v51 = vrot.slane %v1641_v3, 1 }
 0x362   :  { %v1656_v55 = vrot.slane %v3486_v23, 7 }
 0x363   :  { %v1684_v6 = vsel %vm535_vm4, %v1678_v15, %v1679_v51 }
 0x369   :  { %v3492_v1 = vpop.f32.mrf.mxu1 }
 0x36a   :  { %v1657_v58 = vrot.slane %v3492_v1, 7 }
 0x36c   :  { %v1665_v27 = vsel %vm510_vm2, %v1657_v58, %v1650_v34  ;;  %v1644_v34 = vpop.f32.mrf.mxu3  ;;  %v1658_v3 = vsel %vm510_vm2, %v1656_v55, %v1657_v58 }
 0x36d   :  { %v1666_v40 = vmul.f32 %v2728_v14, %v1665_v27  ;;  %v1691_v14 = vmul.f32 %v2708_v44, %v1687_v37  ;;  %v1680_v57 = vrot.slane %v1644_v34, 1  ;;  %v2330_v27 = vld [vmem:[#allocation2 + $0x18] sm:$0xff]  ;;  %v1710_v37 = vadd.f32 %v1702_v50, %v1684_v6  ;;  %v2021_v34 = vld [vmem:[#allocation11 + $0x40] sm:$0xff]  ;;  %v3597_v6 = vld [vmem:[%s3697_s6] ss:$0 sm:$0xff] }
 0x36f   :  { %v1698_v13 = vadd.f32 %v1666_v40, %v1585_v56  ;;  %v1707_v16 = vadd.f32 %v1699_v28, %v1691_v14  ;;  %v1701_v56 = vadd.f32 %v1662_v46, %v1594_v43  ;;  %v133_v40 = vsel %vm129_vm0, %v2330_v27, 0.0  ;;  %v2028_v46 = vld [vmem:[#allocation11 + $0x78] sm:$0xff] }
 0x370   :  { %v1683_v18 = vsel %vm535_vm4, %v1679_v51, %v1680_v57  ;;  %v135_v43 = vsel %vm129_vm0, %v2332_v8, 0.0  ;;  %2034 = vmatpush.msrb.mxu2 %v2028_v46  ;;  %2194 = vmatpush.msra.mxu3 %v2028_v46 }
 0x371   :  { %v1706_v33 = vadd.f32 %v1698_v13, %v1688_v42  ;;  %v1720_v10 = vadd.f32 %v3515_v48, %v1707_v16  ;;  %v1709_v29 = vadd.f32 %v1701_v56, %v1693_v47  ;;  %v1655_v42 = vrot.slane %v3480_v24, 7  ;;  %v1835_v1 = vpop.f32.mrf.mxu1 }
 0x372   :  { %v1695_v14 = vmul.f32 %v2807_v0, %v1683_v18  ;;  %2035 = vmatpush.msrb.mxu2 %v2027_v36  ;;  %2195 = vmatpush.msra.mxu3 %v2027_v36 }
 0x373   :  { %v1719_v30 = vadd.f32 %v3515_v48, %v1706_v33  ;;  %v1728_v31 = vadd.f32 %v1720_v10, %v131_v5  ;;  %v1722_v4 = vadd.f32 %v3515_v48, %v1709_v29  ;;  %v1723_v33 = vadd.f32 %v3515_v48, %v1710_v37  ;;  %v2023_v29 = vld [vmem:[#allocation11 + $0x50] sm:$0xff] }
 0x374   :  { %v1660_v19 = vsel %vm510_vm2, %v1654_v59, %v1655_v42  ;;  %v1647_v63 = vpop.f32.mrf.mxu3  ;;  %v1659_v24 = vsel %vm510_vm2, %v1655_v42, %v1656_v55  ;;  %v2334_v59 = vld [vmem:[#allocation2 + $0x38] sm:$0xff]  ;;  %2036 = vmatpush.msrb.mxu2 %v2026_v9  ;;  %2196 = vmatpush.msra.mxu3 %v2026_v9  ;;  %v2017_v42 = vld [vmem:[#allocation11 + $0x20] sm:$0xff] }
 0x375   :  { %v1727_v44 = vadd.f32 %v1719_v30, %v130_v32  ;;  %v1730_v13 = vadd.f32 %v1722_v4, %v133_v40  ;;  %v134_v32 = vsel %vm129_vm0, %v2331_v49, 0.0  ;;  %v1703_v28 = vadd.f32 %v1660_v19, %v1600_v26  ;;  %v2020_v4 = vld [vmem:[#allocation11 + $0x38] sm:$0xff]  ;;  %v2018_v26 = vld [vmem:[#allocation11 + $0x28] sm:$0xff] }
 0x376   :  { %v1731_v30 = vadd.f32 %v1723_v33, %v134_v32  ;;  %v1681_v16 = vrot.slane %v1647_v63, 1  ;;  %v1672_v23 = vmul.f32 %v2811_v12, %v1659_v24  ;;  %v137_v47 = vsel %vm129_vm0, %v2334_v59, 0.0  ;;  %v2016_v55 = vld [vmem:[#allocation11 + $0x18] sm:$0xff]  ;;  %v2015_v33 = vld [vmem:[#allocation11 + $0x10] sm:$0xff]  ;;  %v2014_v32 = vld [vmem:[#allocation11 + $0x8] sm:$0xff] }
 0x377   :  { %1787 = vmatmul.f32.vlgmr.msrb.gmra.mxu0 %v1727_v44  ;;  %v1711_v39 = vadd.f32 %v1703_v28, %v1695_v14  ;;  %v1603_v44 = vpop.f32.mrf.mxu2 }
 0x378   :  { %v1682_v52 = vsel %vm535_vm4, %v1680_v57, %v1681_v16  ;;  %v1704_v10 = vadd.f32 %v1672_v23, %v1603_v44  ;;  %v1689_v61 = vsel %vm535_vm4, %v1681_v16, %v1674_v35  ;;  %v2019_v57 = vld [vmem:[#allocation11 + $0x30] sm:$0xff] }
 0x379   :  { %v1724_v0 = vadd.f32 %v3515_v48, %v1711_v39  ;;  %v1697_v12 = vmul.f32 %v2826_v20, %v1689_v61 }
 0x37a   :  { %v1712_v25 = vadd.f32 %v1704_v10, %v1682_v52 }
 0x37b   :  { %v1732_v15 = vadd.f32 %v1724_v0, %v135_v43 }
 0x37c   :  { %v1725_v41 = vadd.f32 %v3515_v48, %v1712_v25 }
 0x37f   :  { %1790 = vmatmul.f32.gmra.mxu0 %v1728_v31  ;;  %v1606_v5 = vpop.f32.mrf.mxu2  ;;  %v2333_v31 = vld [vmem:[#allocation2 + $0x30] sm:$0xff] }
 0x380   :  { %v136_v7 = vsel %vm129_vm0, %v2333_v31, 0.0  ;;  %v1705_v21 = vadd.f32 %v1658_v3, %v1606_v5 }
 0x381   :  { %v1733_v38 = vadd.f32 %v1725_v41, %v136_v7 }
 0x382   :  { %v1713_v11 = vadd.f32 %v1705_v21, %v1697_v12 }
 0x384   :  { %v1726_v35 = vadd.f32 %v3515_v48, %v1713_v11  ;;  %v3582_v48 = vpop.f32.mrf.mxu1 }
 0x386   :  { %v1734_v20 = vadd.f32 %v1726_v35, %v137_v47 }
 0x387   :  { %1793 = vmatmul.f32.gmra.mxu0 %v1729_v54 }
 0x38f   :  { %1796 = vmatmul.f32.gmra.mxu0 %v1730_v13 }
 0x397   :  { %1799 = vmatmul.f32.gmra.mxu0 %v1731_v30  ;;  %v2013_v30 = vld [vmem:[#allocation11] sm:$0xff] }
 0x39f   :  { %1802 = vmatmul.f32.gmra.mxu0 %v1732_v15 }
 0x3a7   :  { %1805 = vmatmul.f32.gmra.mxu0 %v1733_v38 }
 0x3af   :  { %1808 = vmatmul.f32.gmra.mxu0 %v1734_v20 }
 0x3b7   :  { %1828 = vmatmul.f32.vlgmr.msra.gmra.mxu0 %v3038_v62  ;;  %v2025_v62 = vld [vmem:[#allocation11 + $0x60] sm:$0xff] }
 0x3b8   :  { %2037 = vmatpush.msrb.mxu2 %v2025_v62  ;;  %2197 = vmatpush.msra.mxu3 %v2025_v62 }
 0x3ba   :  { %2038 = vmatpush.msrb.mxu2 %v2024_v60  ;;  %2198 = vmatpush.msra.mxu3 %v2024_v60 }
 0x3bc   :  { %2039 = vmatpush.msrb.mxu2 %v2023_v29  ;;  %2199 = vmatpush.msra.mxu3 %v2023_v29 }
 0x3be   :  { %2040 = vmatpush.msrb.mxu2 %v2022_v45  ;;  %2200 = vmatpush.msra.mxu3 %v2022_v45 }
 0x3bf   :  { %1831 = vmatmul.f32.gmra.mxu0 %v3056_v17  ;;  %v3586_v17 = vpop.f32.mrf.mxu1 }
 0x3c0   :  { %2041 = vmatpush.msrb.mxu2 %v2021_v34  ;;  %2201 = vmatpush.msra.mxu3 %v2021_v34 }
 0x3c2   :  { %2042 = vmatpush.msrb.mxu2 %v2020_v4  ;;  %2202 = vmatpush.msra.mxu3 %v2020_v4 }
 0x3c4   :  { %2043 = vmatpush.msrb.mxu2 %v2019_v57  ;;  %2203 = vmatpush.msra.mxu3 %v2019_v57 }
 0x3c6   :  { %2204 = vmatpush.msra.mxu3 %v2018_v26  ;;  %2044 = vmatpush.msrb.mxu2 %v2018_v26 }
 0x3c7   :  { %v3590_v54 = vpop.f32.mrf.mxu1 }
 0x3c8   :  { %2205 = vmatpush.msra.mxu3 %v2017_v42  ;;  %2045 = vmatpush.msrb.mxu2 %v2017_v42 }
 0x3ca   :  { %2206 = vmatpush.msra.mxu3 %v2016_v55  ;;  %2046 = vmatpush.msrb.mxu2 %v2016_v55 }
 0x3cc   :  { %2207 = vmatpush.msra.mxu3 %v2015_v33  ;;  %2047 = vmatpush.msrb.mxu2 %v2015_v33 }
 0x3ce   :  { %2208 = vmatpush.msra.mxu3 %v2014_v32  ;;  %2048 = vmatpush.msrb.mxu2 %v2014_v32 }
 0x3cf   :  { %v1847_v27 = vpop.f32.mrf.mxu1 }
 0x3d0   :  { %2209 = vmatpush.msra.mxu3 %v2013_v30  ;;  %2049 = vmatpush.msrb.mxu2 %v2013_v30 }
 0x3d7   :  { %v1850_v28 = vpop.f32.mrf.mxu1 }
 0x3f4   :  { %v3578_v2 = vpop.f32.mrf.mxu0 }
 0x3f5   :  { %v1789_v0 = vadd.f32 %v3597_v6, %v3578_v2 }
 0x3fc   :  { %v3580_v58 = vpop.f32.mrf.mxu0 }
 0x3fd   :  { %v1792_v3 = vadd.f32 %v3597_v6, %v3580_v58 }
 0x404   :  { %v1794_v22 = vpop.f32.mrf.mxu0 }
 0x405   :  { %v1795_v37 = vadd.f32 %v3597_v6, %v1794_v22 }
 0x407   :  { %v3604_v14 = vadd.f32 %v1835_v1, %v1795_v37 }
 0x409   :  { %v2155_v63 = vmul.f32 -1.442695, %v3604_v14 }
 0x40c   :  { %v3584_v53 = vpop.f32.mrf.mxu0 }
 0x40d   :  { %v1798_v16 = vadd.f32 %v3597_v6, %v3584_v53 }
 0x40f   :  { %v3618_v43 = vadd.f32 %v3582_v48, %v1798_v16 }
 0x411   :  { %v2156_v5 = vmul.f32 -1.442695, %v3618_v43 }
 0x414   :  { %v3588_v56 = vpop.f32.mrf.mxu0 }
 0x415   :  { %v1801_v12 = vadd.f32 %v3597_v6, %v3588_v56 }
 0x417   :  { %v3631_v35 = vadd.f32 %v3586_v17, %v1801_v12 }
 0x419   :  { %v2157_v36 = vmul.f32 -1.442695, %v3631_v35 }
 0x41c   :  { %v3592_v51 = vpop.f32.mrf.mxu0 }
 0x41d   :  { %v1804_v53 = vadd.f32 %v3597_v6, %v3592_v51 }
 0x41f   :  { %v3642_v57 = vadd.f32 %v3590_v54, %v1804_v53 }
 0x421   :  { %v2158_v42 = vmul.f32 -1.442695, %v3642_v57 }
 0x424   :  { %v1806_v40 = vpop.f32.mrf.mxu0 }
 0x425   :  { %v1807_v50 = vadd.f32 %v3597_v6, %v1806_v40 }
 0x427   :  { %v3601_v13 = vadd.f32 %v1847_v27, %v1807_v50 }
 0x429   :  { %v2159_v18 = vmul.f32 -1.442695, %v3601_v13 }
 0x42b   :  { %2295 = vpow2.f32 %v2159_v18 }
 0x42c   :  { %v1809_v19 = vpop.f32.mrf.mxu0  ;;  %2297 = vpow2.f32 %v2155_v63 }
 0x42d   :  { %v1810_v49 = vadd.f32 %v3597_v6, %v1809_v19 }
 0x42f   :  { %v3608_v24 = vadd.f32 %v1850_v28, %v1810_v49 }
 0x431   :  { %v2296_v39 = vpop.eup %2295  ;;  %v2160_v44 = vmul.f32 -1.442695, %v3608_v24 }
 0x432   :  { %v1883_v23 = vadd.f32 1.0, %v2296_v39  ;;  %v2298_v25 = vpop.eup %2297 }
 0x433   :  { %2299 = vpow2.f32 %v2160_v44  ;;  %v3626_v7 = vadd.f32 1.0, %v2298_v25 }
 0x434   :  { %2301 = vrcp.f32 %v1883_v23  ;;  %v1829_v52 = vpop.f32.mrf.mxu0  ;;  %v1986_v59 = vand.u32 2147483648, %v1883_v23  ;;  %v1984_v2 = vand.u32 2147483647, %v1883_v23  ;;  %vm1980_vm2 = vweird.f32 %v1883_v23 }
 0x435   :  { %v3615_v8 = vadd.f32 %v1829_v52, %v1789_v0 }
 0x436   :  { %v1987_v48 = vor.u32 1.1754944e-38, %v1986_v59  ;;  %vm1985_vm10 = vcmp.eq.f32.partialorder %v1984_v2, 8.507059e+37 }
 0x437   :  { %v2153_v10 = vmul.f32 -1.442695, %v3615_v8 }
 0x439   :  { %v2300_v15 = vpop.eup %2299  ;;  %2303 = vpow2.f32 %v2153_v10 }
 0x43a   :  { %v2302_v61 = vpop.eup %2301  ;;  %v1884_v41 = vadd.f32 1.0, %v2300_v15 }
 0x43b   :  { %v1976_v31 = vmul.f32 %v2302_v61, %v1883_v23  ;;  %vm1981_vm0 = vweird.f32 %v2302_v61 }
 0x43c   :  { %2305 = vrcp.f32 %v1884_v41  ;;  %v1832_v21 = vpop.f32.mrf.mxu0  ;;  %vm1982_vm4 = vmor %vm1980_vm2, %vm1981_vm0  ;;  %v2001_v34 = vand.u32 2147483648, %v1884_v41  ;;  %v1999_v51 = vand.u32 2147483647, %v1884_v41  ;;  %vm1995_vm12 = vweird.f32 %v1884_v41 }
 0x43d   :  { %v1977_v38 = vsub.f32 1.0, %v1976_v31  ;;  %v3628_v11 = vadd.f32 %v1832_v21, %v1792_v3  ;;  %2307 = vpow2.f32 %v2156_v5  ;;  %vm1920_vm2 = vweird.f32 %v3626_v7 }
 0x43e   :  { %2309 = vrcp.f32 %v3626_v7  ;;  %vm2000_vm14 = vcmp.eq.f32.partialorder %v1999_v51, 8.507059e+37 }
 0x43f   :  { %v2304_v47 = vpop.eup %2303  ;;  %v1978_v20 = vmul.f32 %v2302_v61, %v1977_v38  ;;  %v2154_v1 = vmul.f32 -1.442695, %v3628_v11 }
 0x440   :  { %v1877_v58 = vadd.f32 1.0, %v2304_v47 }
 0x441   :  { %v1979_v22 = vadd.f32 %v2302_v61, %v1978_v20  ;;  %2311 = vpow2.f32 %v2154_v1 }
 0x442   :  { %v2306_v46 = vpop.eup %2305  ;;  %2313 = vrcp.f32 %v1877_v58  ;;  %v1896_v33 = vand.u32 2147483648, %v1877_v58  ;;  %v1894_v28 = vand.u32 2147483647, %v1877_v58  ;;  %vm1890_vm1 = vweird.f32 %v1877_v58 }
 0x443   :  { %v1983_v9 = vsel %vm1982_vm4, %v2302_v61, %v1979_v22  ;;  %v1991_v62 = vmul.f32 %v2306_v46, %v1884_v41  ;;  %v2308_v17 = vpop.eup %2307  ;;  %2315 = vpow2.f32 %v2157_v36  ;;  %vm1996_vm11 = vweird.f32 %v2306_v46 }
 0x444   :  { %v1988_v56 = vsel %vm1985_vm10, %v1987_v48, %v1983_v9  ;;  %v3639_v45 = vpop.eup %2309  ;;  %v3644_v40 = vadd.f32 1.0, %v2308_v17  ;;  %vm1997_vm13 = vmor %vm1995_vm12, %vm1996_vm11  ;;  %v1897_v16 = vor.u32 1.1754944e-38, %v1896_v33  ;;  %vm1895_vm5 = vcmp.eq.f32.partialorder %v1894_v28, 8.507059e+37 }
 0x445   :  { %v2011_v60 = vmul.f32 %v1988_v56, %v3601_v13  ;;  %v1992_v29 = vsub.f32 1.0, %v1991_v62  ;;  %v2002_v13 = vor.u32 1.1754944e-38, %v2001_v34  ;;  %v1916_v49 = vmul.f32 %v3639_v45, %v3626_v7 }
 0x446   :  { %vm1921_vm9 = vweird.f32 %v3639_v45  ;;  %vm1935_vm12 = vweird.f32 %v3644_v40 }
 0x447   :  { %v2312_v4 = vpop.eup %2311  ;;  %2068 = vmatmul.f32.vlgmr.msra.gmra.mxu3 %v2011_v60  ;;  %v1993_v27 = vmul.f32 %v2306_v46, %v1992_v29  ;;  %v1917_v23 = vsub.f32 1.0, %v1916_v49  ;;  %vm1922_vm4 = vmor %vm1920_vm2, %vm1921_vm9  ;;  %v1941_v60 = vand.u32 2147483648, %v3644_v40  ;;  %v1939_v29 = vand.u32 2147483647, %v3644_v40 }
 0x448   :  { %v2314_v6 = vpop.eup %2313  ;;  %v1878_v50 = vadd.f32 1.0, %v2312_v4 }
 0x449   :  { %v1886_v26 = vmul.f32 %v2314_v6, %v1877_v58  ;;  %v1994_v37 = vadd.f32 %v2306_v46, %v1993_v27  ;;  %v2316_v54 = vpop.eup %2315  ;;  %vm1891_vm15 = vweird.f32 %v2314_v6  ;;  %v1918_v5 = vmul.f32 %v3639_v45, %v1917_v23 }
 0x44a   :  { %2317 = vrcp.f32 %v1878_v50  ;;  %v3651_v44 = vadd.f32 1.0, %v2316_v54  ;;  %vm1892_vm3 = vmor %vm1890_vm1, %vm1891_vm15  ;;  %v1909_v3 = vand.u32 2147483647, %v1878_v50  ;;  %vm1905_vm7 = vweird.f32 %v1878_v50 }
 0x44b   :  { %v1887_v18 = vsub.f32 1.0, %v1886_v26  ;;  %v1998_v55 = vsel %vm1997_vm13, %v2306_v46, %v1994_v37  ;;  %2319 = vrcp.f32 %v3644_v40  ;;  %v1919_v47 = vadd.f32 %v3639_v45, %v1918_v5 }
 0x44c   :  { %v2003_v19 = vsel %vm2000_vm14, %v2002_v13, %v1998_v55  ;;  %2321 = vpow2.f32 %v2158_v42  ;;  %vm1910_vm0 = vcmp.eq.f32.partialorder %v1909_v3, 8.507059e+37  ;;  %v1926_v58 = vand.u32 2147483648, %v3626_v7 }
 0x44d   :  { %v1888_v32 = vmul.f32 %v2314_v6, %v1887_v18  ;;  %v2012_v63 = vmul.f32 %v2003_v19, %v3608_v24  ;;  %2323 = vrcp.f32 %v3651_v44  ;;  %v1911_v24 = vand.u32 2147483648, %v1878_v50 }
 0x44e   :  { %v1924_v46 = vand.u32 2147483647, %v3626_v7  ;;  %v1923_v36 = vsel %vm1922_vm4, %v3639_v45, %v1919_v47  ;;  %v1927_v9 = vor.u32 1.1754944e-38, %v1926_v58  ;;  %v1942_v27 = vor.u32 1.1754944e-38, %v1941_v60 }
 0x44f   :  { %v1889_v30 = vadd.f32 %v2314_v6, %v1888_v32  ;;  %2071 = vmatmul.f32.gmra.mxu3 %v2012_v63  ;;  %v1912_v59 = vor.u32 1.1754944e-38, %v1911_v24  ;;  %vm1940_vm14 = vcmp.eq.f32.partialorder %v1939_v29, 8.507059e+37  ;;  %v1956_v26 = vand.u32 2147483648, %v3651_v44  ;;  %v2230_v63 = vld [vmem:[%s3697_s6 + $0x1] ss:$0 sm:$0xff]  ;;  %s2527_s6 = smov [#allocation13]  }
 0x450   :  { %v2318_v39 = vpop.eup %2317  ;;  %vm1925_vm10 = vcmp.eq.f32.partialorder %v1924_v46, 8.507059e+37  ;;  %vm1950_vm1 = vweird.f32 %v3651_v44  ;;  %s2087_s14 = sshll.u32 %s2527_s6, 4  ;;  %s2088_s14 = int_to_ptr.vmem [resolvable:$true] %s2087_s14 }
 0x451   :  { %v1893_v0 = vsel %vm1892_vm3, %v2314_v6, %v1889_v30  ;;  %v1901_v52 = vmul.f32 %v2318_v39, %v1878_v50  ;;  %v2320_v10 = vpop.eup %2319  ;;  %vm1906_vm6 = vweird.f32 %v2318_v39  ;;  %v1928_v62 = vsel %vm1925_vm10, %v1927_v9, %v1923_v36 }
 0x452   :  { %v1898_v25 = vsel %vm1895_vm5, %v1897_v16, %v1893_v0  ;;  %v2322_v12 = vpop.eup %2321  ;;  %v1931_v31 = vmul.f32 %v2320_v10, %v3644_v40  ;;  %vm1907_vm8 = vmor %vm1905_vm7, %vm1906_vm6  ;;  %vm1936_vm11 = vweird.f32 %v2320_v10  ;;  %v2007_v7 = vmul.f32 %v1928_v62, %v3604_v14 }
 0x453   :  { %v2005_v15 = vmul.f32 %v1898_v25, %v3615_v8  ;;  %v1902_v61 = vsub.f32 1.0, %v1901_v52  ;;  %v3657_v38 = vadd.f32 1.0, %v2322_v12  ;;  %v2324_v2 = vpop.eup %2323  ;;  %vm1937_vm13 = vmor %vm1935_vm12, %vm1936_vm11  ;;  %v1954_v40 = vand.u32 2147483647, %v3651_v44 }
 0x454   :  { %v1932_v20 = vsub.f32 1.0, %v1931_v31  ;;  %v1946_v53 = vmul.f32 %v2324_v2, %v3651_v44  ;;  %vm1951_vm15 = vweird.f32 %v2324_v2  ;;  %v1957_v42 = vor.u32 1.1754944e-38, %v1956_v26 }
 0x455   :  { %v1903_v41 = vmul.f32 %v2318_v39, %v1902_v61  ;;  %2050 = vmatmul.f32.vlgmr.msrb.gmra.mxu2 %v2005_v15  ;;  %2325 = vrcp.f32 %v3657_v38  ;;  %vm1952_vm3 = vmor %vm1950_vm1, %vm1951_vm15  ;;  %vm1955_vm5 = vcmp.eq.f32.partialorder %v1954_v40, 8.507059e+37  ;;  %v1971_v54 = vand.u32 2147483648, %v3657_v38 }
 0x456   :  { %v1933_v48 = vmul.f32 %v2320_v10, %v1932_v20  ;;  %v1947_v56 = vsub.f32 1.0, %v1946_v53  ;;  %vm1965_vm7 = vweird.f32 %v3657_v38 }
 0x457   :  { %v1904_v21 = vadd.f32 %v2318_v39, %v1903_v41  ;;  %v1972_v49 = vor.u32 1.1754944e-38, %v1971_v54 }
 0x458   :  { %v1934_v17 = vadd.f32 %v2320_v10, %v1933_v48  ;;  %v1948_v34 = vmul.f32 %v2324_v2, %v1947_v56 }
 0x459   :  { %v1908_v8 = vsel %vm1907_vm8, %v2318_v39, %v1904_v21 }
 0x45a   :  { %v1913_v1 = vsel %vm1910_vm0, %v1912_v59, %v1908_v8  ;;  %v1938_v45 = vsel %vm1937_vm13, %v2320_v10, %v1934_v17  ;;  %v1949_v6 = vadd.f32 %v2324_v2, %v1948_v34 }
 0x45b   :  { %v2006_v22 = vmul.f32 %v1913_v1, %v3628_v11  ;;  %v2326_v11 = vpop.eup %2325  ;;  %v1943_v51 = vsel %vm1940_vm14, %v1942_v27, %v1938_v45 }
 0x45c   :  { %v1961_v4 = vmul.f32 %v2326_v11, %v3657_v38  ;;  %v2008_v14 = vmul.f32 %v1943_v51, %v3618_v43  ;;  %v1953_v37 = vsel %vm1952_vm3, %v2324_v2, %v1949_v6  ;;  %vm1966_vm6 = vweird.f32 %v2326_v11 }
 0x45d   :  { %2053 = vmatmul.f32.gmra.mxu2 %v2006_v22  ;;  %v1958_v18 = vsel %vm1955_vm5, %v1957_v42, %v1953_v37  ;;  %v1969_v43 = vand.u32 2147483647, %v3657_v38  ;;  %vm1967_vm8 = vmor %vm1965_vm7, %vm1966_vm6 }
 0x45e   :  { %v1962_v50 = vsub.f32 1.0, %v1961_v4  ;;  %v2009_v33 = vmul.f32 %v1958_v18, %v3631_v35 }
 0x45f   :  { %vm1970_vm9 = vcmp.eq.f32.partialorder %v1969_v43, 8.507059e+37 }
 0x460   :  { %v1963_v13 = vmul.f32 %v2326_v11, %v1962_v50 }
 0x462   :  { %v1964_v55 = vadd.f32 %v2326_v11, %v1963_v13 }
 0x464   :  { %v1968_v19 = vsel %vm1967_vm8, %v2326_v11, %v1964_v55 }
 0x465   :  { %2056 = vmatmul.f32.gmra.mxu2 %v2007_v7  ;;  %v1973_v32 = vsel %vm1970_vm9, %v1972_v49, %v1968_v19 }
 0x466   :  { %v2010_v28 = vmul.f32 %v1973_v32, %v3642_v57 }
 0x46d   :  { %2059 = vmatmul.f32.gmra.mxu2 %v2008_v14 }
 0x475   :  { %2062 = vmatmul.f32.gmra.mxu2 %v2009_v33 }
 0x47d   :  { %2065 = vmatmul.f32.gmra.mxu2 %v2010_v28 }
 0x4ca   :  { %v2069_v30 = vpop.f32.mrf.mxu3 }
 0x4cb   :  { %v2070_v39 = vadd.f32 %v2230_v63, %v2069_v30 }
 0x4cd   :  { %2081 = vst [vmem:[#allocation13 + $0x30] sm:$0xff] %v2070_v39 }
 0x4d2   :  { %v2072_v35 = vpop.f32.mrf.mxu3 }
 0x4d3   :  { %v2073_v44 = vadd.f32 %v2230_v63, %v2072_v35 }
 0x4d5   :  { %2082 = vst [vmem:[#allocation13 + $0x38] sm:$0xff] %v2073_v44 }
 0x4d8   :  { %v2051_v16 = vpop.f32.mrf.mxu2 }
 0x4d9   :  { %v2052_v23 = vadd.f32 %v2230_v63, %v2051_v16 }
 0x4db   :  { %2075 = vst [vmem:[#allocation13] sm:$0xff] %v2052_v23 }
 0x4e0   :  { %v2054_v0 = vpop.f32.mrf.mxu2 }
 0x4e1   :  { %v2055_v52 = vadd.f32 %v2230_v63, %v2054_v0 }
 0x4e3   :  { %2076 = vst [vmem:[#allocation13 + $0x8] sm:$0xff] %v2055_v52 }
 0x4e8   :  { %v2057_v10 = vpop.f32.mrf.mxu2 }
 0x4e9   :  { %v2058_v25 = vadd.f32 %v2230_v63, %v2057_v10 }
 0x4eb   :  { %2077 = vst [vmem:[#allocation13 + $0x10] sm:$0xff] %v2058_v25 }
 0x4f0   :  { %v2060_v57 = vpop.f32.mrf.mxu2 }
 0x4f1   :  { %v2061_v15 = vadd.f32 %v2230_v63, %v2060_v57 }
 0x4f3   :  { %2078 = vst [vmem:[#allocation13 + $0x18] sm:$0xff] %v2061_v15 }
 0x4f8   :  { %v2063_v61 = vpop.f32.mrf.mxu2 }
 0x4f9   :  { %v2064_v24 = vadd.f32 %v2230_v63, %v2063_v61 }
 0x4fb   :  { %2079 = vst [vmem:[#allocation13 + $0x20] sm:$0xff] %v2064_v24 }
 0x500   :  { %v2066_v5 = vpop.f32.mrf.mxu2 }
 0x501   :  { %v2067_v12 = vadd.f32 %v2230_v63, %v2066_v5 }
 0x503   :  { %2080 = vst [vmem:[#allocation13 + $0x28] sm:$0xff] %v2067_v12 }
 0x504   :  { %2095 = dma.vmem_to_hbm [thread:$0]  %s2088_s14, 1024, %s2090_s17, [#allocation4], %s2514_s9, %s2514_s9, %s2515_s10  }
 0x505   :  { %2511 = dma.done.wait [#allocation4], 1024  }
 0x506   :  { %2512 = vsyncadd [#allocation4], 4294966272 }
 0x507   :  { %2100 = vsyncpa [#allocation3], 1 }
 0x508   :  { %2101 = vsyncpa [#allocation6], 1 }
 0x509   :  { %2102 = vsyncpa [#allocation9], 1 }
 0x50a   :  { %2103 = vsyncpa [#allocation12], 1 }
 0x50b   :  { %2104 = vsyncpa [#allocation4], 1 }

</bundles_post_ra>
